<compile_context>
chip_gen: v5e
topology: v5e:2x2
jax: 0.10.0
libtpu: 0.0.40
codegen_flags: <defaults>
</compile_context>

<pallas_src>
import functools

import jax
import jax.numpy as jnp
from jax import lax
from jax.experimental import pallas as pl
from jax.experimental.pallas import tpu as pltpu

_LANE = 128


def _round_up(x, m):
    return (x + m - 1) // m * m


@functools.lru_cache(maxsize=1)
def _vmem_limit_and_target():
    """Generation-aware VMEM budget + row-tile target.

    v7x (64 MiB physical)  -> 48 MiB budget, 2048-row tiles.
    v5e/v6e (128 MiB)      -> 96 MiB budget, 4096-row tiles.
    Falls back to the conservative 48 MiB / 2048 if the query is unavailable.
    """
    phys = 64 << 20
    try:
        info = pltpu.get_tpu_info()
        v = getattr(info, "vmem_capacity_bytes", None)
        if v:
            phys = int(v)
    except Exception:
        pass
    limit = min(phys * 3 // 4, 112 << 20)
    target = 4096 if limit >= (64 << 20) else 2048
    return int(limit), int(target)


def _pick_row_tile(ho, wo, target_rows):
    """Largest th dividing ho with th*wo <= target and (th*wo) % 8 == 0 (else th = ho).

    th | ho keeps every grid tile made of real output rows only, so the in-kernel BN
    partial sums are exact without masking.
    """
    if ho * wo <= target_rows:
        return ho
    for th in range(ho - 1, 0, -1):
        if ho % th == 0 and th * wo <= target_rows and (th * wo) % 8 == 0:
            return th
    return ho


def _pick_batch_fold(n, cap):
    """Largest divisor of n that is <= cap (capped at 32 to bound kernel unrolling)."""
    cap = max(1, min(cap, n, 32))
    for nb in range(cap, 0, -1):
        if n % nb == 0:
            return nb
    return 1


def _pick_flat_tile(rows, target):
    if rows <= target:
        return rows
    for tm in range(target, 7, -1):
        if rows % tm == 0 and tm % 8 == 0:
            return tm
    return target  # non-dividing fallback: Pallas masks the partial last block


# --------------------------------------------------------------------------------------
# Kernel A: 3x3 conv (3 shifted MXU matmuls per image) + per-image-tile BN partial sums.
# --------------------------------------------------------------------------------------
def _conv_stats_kernel(x_ref, w_ref, y_ref, s_ref, acc_ref, *, th, wo, stride, nb):
    """One (batch-block, row-tile) grid step.

    x_ref  : (nb, s, Hq*Wo, Kp) bf16  width-gathered padded input; rows grouped by
                                      height-phase so stride-s row picks are plain
                                      dynamic slices (no strided loads).
    w_ref  : (3, Kp, Cp)        bf16  one (K, Cp) weight slab per kernel row dh.
    y_ref  : (nb, th*Wo, Cp)    bf16  raw conv output rows of this tile.
    s_ref  : (1, 1, 2*nb, Cp)   f32   per image-tile [sum, centered sum-of-squares].
    acc_ref: (th*Wo, Cp)        f32   VMEM accumulator, reused across the nb images.
    """
    t = pl.program_id(1)
    m = th * wo
    for i in range(nb):                          # images folded into this grid step
        for dh in range(3):                      # 3 kernel rows -> 3 shifted matmuls
            row0 = (t * th + dh // stride) * wo
            if wo % 8 == 0:                      # sublane-aligned start when possible
                row0 = pl.multiple_of(row0, 8)
            rows = x_ref[i, dh % stride, pl.ds(row0, m), :]          # (m, Kp) bf16
            contrib = jnp.dot(rows, w_ref[dh, :, :],
                              preferred_element_type=jnp.float32)
            if dh == 0:
                acc_ref[...] = contrib
            else:
                acc_ref[...] += contrib
        acc = acc_ref[...]
        y_ref[i] = acc.astype(y_ref.dtype)
        # numerically safe one-pass stats: sum + tile-centered sum of squares (f32)
        ssum = jnp.sum(acc, axis=0, keepdims=True)
        d = acc - ssum * (1.0 / m)
        s_ref[0, 0, 2 * i:2 * i + 1, :] = ssum
        s_ref[0, 0, 2 * i + 1:2 * i + 2, :] = jnp.sum(d * d, axis=0, keepdims=True)


def _conv3x3_bn_stats(x_nhwc, w_oihw, *, stride, cout_p):
    """3x3 conv (padding=1, bias-free) + per-channel batch partial sums.

    Returns the raw conv output (N, Ho*Wo, cout_p) in bf16 (channels zero-padded),
    the per-image-tile stats (B, T, nb, 2, cout_p), rows-per-tile and (Ho, Wo).
    The wrapper only does layout work (spatial pad + 3x width-tap gather in bf16);
    all matmuls and the per-tile stats run inside the Pallas kernel.
    """
    assert stride in (1, 2)
    N, H, W, cin = x_nhwc.shape
    cout = w_oihw.shape[0]
    Ho = (H - 1) // stride + 1
    Wo = (W - 1) // stride + 1
    Kp = _round_up(3 * cin, _LANE)               # concat taps first, then pad K once
    vmem_limit, target_rows = _vmem_limit_and_target()

    # ---- layout glue (pure data movement, bf16) -------------------------------------
    x = x_nhwc.astype(jnp.bfloat16)
    Hp = _round_up(H + 2, stride)                # padded height, multiple of stride
    xp = jnp.pad(x, ((0, 0), (1, Hp - H - 1), (1, 1), (0, 0)))
    xg = jnp.concatenate(                        # gather only the 3 width taps
        [xp[:, :, dw:dw + (Wo - 1) * stride + 1:stride, :] for dw in range(3)],
        axis=-1)                                 # (N, Hp, Wo, 3*cin)
    xg = jnp.pad(xg, ((0, 0), (0, 0), (0, 0), (0, Kp - 3 * cin)))
    Hq = Hp // stride                            # group rows by height phase
    xg = xg.reshape(N, Hq, stride, Wo, Kp).transpose(0, 2, 1, 3, 4)
    xg = xg.reshape(N, stride, Hq * Wo, Kp)

    w = jnp.transpose(w_oihw, (2, 3, 1, 0)).reshape(3, 3 * cin, cout)   # (dh, dw*cin, co)
    w = jnp.pad(w, ((0, 0), (0, Kp - 3 * cin), (0, cout_p - cout))).astype(jnp.bfloat16)

    # ---- tiling / batch folding -------------------------------------------------------
    th = _pick_row_tile(Ho, Wo, target_rows)
    T = Ho // th
    m = th * Wo
    nb = _pick_batch_fold(N, target_rows // m) if T == 1 else 1
    B = N // nb

    y, part = pl.pallas_call(
        functools.partial(_conv_stats_kernel, th=th, wo=Wo, stride=stride, nb=nb),
        out_shape=(
            jax.ShapeDtypeStruct((N, Ho * Wo, cout_p), jnp.bfloat16),
            jax.ShapeDtypeStruct((B, T, 2 * nb, cout_p), jnp.float32),
        ),
        grid=(B, T),
        in_specs=[
            pl.BlockSpec((nb, stride, Hq * Wo, Kp), lambda b, t: (b, 0, 0, 0)),
            pl.BlockSpec((3, Kp, cout_p), lambda b, t: (0, 0, 0)),
        ],
        out_specs=(
            pl.BlockSpec((nb, th * Wo, cout_p), lambda b, t: (b, t, 0)),
            pl.BlockSpec((1, 1, 2 * nb, cout_p), lambda b, t: (b, t, 0, 0)),
        ),
        scratch_shapes=[pltpu.VMEM((m, cout_p), jnp.float32)],
        compiler_params=pltpu.CompilerParams(
            # no cross-tile accumulation -> both axes independent (v7x megacore)
            dimension_semantics=("parallel", "parallel"),
            vmem_limit_bytes=vmem_limit,
        ),
    )(xg, w)

    part = part.reshape(B, T, nb, 2, cout_p)
    return y, part, m, (Ho, Wo)


def _fold_bn(part, rows_per_tile, gamma, beta, *, eps, cout_p):
    """Chan-combine per-tile (sum, centered M2) into batch mean/var, fold gamma/beta."""
    sums = part[..., 0, :]                                   # (B, T, nb, Cp)
    m2s = part[..., 1, :]
    n_tiles = sums.shape[0] * sums.shape[1] * sums.shape[2]
    cnt = n_tiles * rows_per_tile
    mean_t = sums / rows_per_tile
    mean = jnp.sum(sums, axis=(0, 1, 2)) / cnt
    var = (jnp.sum(m2s, axis=(0, 1, 2))
           + rows_per_tile * jnp.sum(jnp.square(mean_t - mean), axis=(0, 1, 2))) / cnt
    var = jnp.maximum(var, 0.0)                              # biased variance (training BN)
    g = jnp.pad(gamma.astype(jnp.float32), (0, cout_p - gamma.shape[0]))
    b = jnp.pad(beta.astype(jnp.float32), (0, cout_p - beta.shape[0]))
    scale = g * lax.rsqrt(var + eps)
    shift = b - mean * scale
    return scale, shift


# --------------------------------------------------------------------------------------
# Kernel B: BN affine (+ optional ReLU), lane-dense, large row tiles (final stage only).
# --------------------------------------------------------------------------------------
def _bn_act_kernel(y_ref, scale_ref, shift_ref, o_ref, *, relu):
    y = y_ref[...].astype(jnp.float32) * scale_ref[...] + shift_ref[...]
    if relu:
        y = jnp.maximum(y, 0.0)
    o_ref[...] = y.astype(o_ref.dtype)


def _bn_act(y, scale, shift, *, relu, out_dtype):
    N, M, cp = y.shape
    rows = N * M
    vmem_limit, target_rows = _vmem_limit_and_target()
    tm = _pick_flat_tile(rows, max(target_rows, 1024))
    out = pl.pallas_call(
        functools.partial(_bn_act_kernel, relu=relu),
        out_shape=jax.ShapeDtypeStruct((rows, cp), out_dtype),
        grid=(pl.cdiv(rows, tm),),
        in_specs=[
            pl.BlockSpec((tm, cp), lambda i: (i, 0)),
            pl.BlockSpec((1, cp), lambda i: (0, 0)),
            pl.BlockSpec((1, cp), lambda i: (0, 0)),
        ],
        out_specs=pl.BlockSpec((tm, cp), lambda i: (i, 0)),
        compiler_params=pltpu.CompilerParams(
            dimension_semantics=("parallel",),
            vmem_limit_bytes=vmem_limit,
        ),
    )(y.reshape(rows, cp), scale.reshape(1, cp), shift.reshape(1, cp))
    return out.reshape(N, M, cp)


# --------------------------------------------------------------------------------------
# Full module forward.
# --------------------------------------------------------------------------------------
def basic_transform(x_nchw, params, *, stride, eps=1e-5):
    """BasicTransform.forward: conv3x3(s) -> BN -> ReLU -> conv3x3(1) -> BN (NHWC inside)."""
    N, Cin, H, W = x_nchw.shape
    Cout = params["wa"].shape[0]
    cout_p = _round_up(Cout, _LANE)

    x = jnp.transpose(x_nchw, (0, 2, 3, 1))                      # NCHW -> NHWC (once)

    # stage a: conv(stride) + in-kernel BN partial stats (output kept bf16)
    ya, part_a, rows_a, (Ho, Wo) = _conv3x3_bn_stats(
        x, params["wa"], stride=stride, cout_p=cout_p)
    scale_a, shift_a = _fold_bn(part_a, rows_a, params["ga"], params["ba"],
                                eps=eps, cout_p=cout_p)

    # stage-a BN apply + ReLU is folded (by XLA fusion) into the pad/width-gather
    # that builds stage b's input slab -> no standalone elementwise kernel and no
    # extra HBM round trip of the stage-a activation.
    a = jnp.maximum(ya.astype(jnp.float32) * scale_a + shift_a, 0.0).astype(jnp.bfloat16)
    a = a.reshape(N, Ho, Wo, cout_p)[..., :Cout]

    # stage b: conv(1) + in-kernel BN partial stats, then final BN affine in Pallas
    yb, part_b, rows_b, _ = _conv3x3_bn_stats(a, params["wb"], stride=1, cout_p=cout_p)
    scale_b, shift_b = _fold_bn(part_b, rows_b, params["gb"], params["bb"],
                                eps=eps, cout_p=cout_p)
    out = _bn_act(yb, scale_b, shift_b, relu=False, out_dtype=jnp.float32)

    out = out.reshape(N, Ho, Wo, cout_p)[..., :Cout]
    return jnp.transpose(out, (0, 3, 1, 2))                      # NHWC -> NCHW (once)


def _reference_forward(x_nchw, params, *, stride, eps=1e-5):
    """Pure-JAX reference.  Conv inputs and stored conv outputs are quantized to bf16
    (f32 accumulation), matching the kernel's MXU / storage precision."""
    def conv(x, w, s):
        return lax.conv_general_dilated(
            x.astype(jnp.bfloat16), w.astype(jnp.bfloat16), (s, s), ((1, 1), (1, 1)),
            dimension_numbers=("NCHW", "OIHW", "NCHW"),
            preferred_element_type=jnp.float32)

    def bn(x, g, b):
        mean = jnp.mean(x, axis=(0, 2, 3), keepdims=True)
        var = jnp.mean(jnp.square(x - mean), axis=(0, 2, 3), keepdims=True)
        return (x - mean) * lax.rsqrt(var + eps) * g.reshape(1, -1, 1, 1) \
               + b.reshape(1, -1, 1, 1)

    q = lambda v: v.astype(jnp.bfloat16).astype(jnp.float32)
    ya = q(conv(x_nchw, params["wa"], stride))
    a = q(jnp.maximum(bn(ya, params["ga"], params["ba"]), 0.0))
    yb = q(conv(a, params["wb"], 1))
    return bn(yb, params["gb"], params["bb"])


if __name__ == "__main__":
    # Small shapes consistent with the module: N=2, dim_in=4, dim_out=8, 16x16, stride=2.
    N, Cin, Cout, H, W, stride = 2, 4, 8, 16, 16, 2
    # TODO(synk): temp_kernel_size is stored by __init__ but unused in forward; ignored here.
    # TODO(synk): BatchNorm running-stat (momentum) buffer updates are training-state
    #             bookkeeping and are not reproduced; normalization uses batch stats.

    key = jax.random.PRNGKey(0)
    k_x, k_wa, k_wb, k_ga, k_ba, k_gb, k_bb = jax.random.split(key, 7)

    x = jax.random.normal(k_x, (N, Cin, H, W), dtype=jnp.float32)
    params = {
        "wa": 0.1 * jax.random.normal(k_wa, (Cout, Cin, 3, 3), dtype=jnp.float32),
        "wb": 0.1 * jax.random.normal(k_wb, (Cout, Cout, 3, 3), dtype=jnp.float32),
        "ga": 1.0 + 0.1 * jax.random.normal(k_ga, (Cout,), dtype=jnp.float32),
        "ba": 0.1 * jax.random.normal(k_ba, (Cout,), dtype=jnp.float32),
        "gb": 1.0 + 0.1 * jax.random.normal(k_gb, (Cout,), dtype=jnp.float32),
        "bb": 0.1 * jax.random.normal(k_bb, (Cout,), dtype=jnp.float32),
    }

    fwd = jax.jit(functools.partial(basic_transform, stride=stride))
    out = jax.block_until_ready(fwd(x, params))

    ref = _reference_forward(x, params, stride=stride)
    assert out.shape == (N, Cout, H // stride, W // stride), out.shape
    max_err = float(jnp.max(jnp.abs(out - ref)))
    assert jnp.allclose(out, ref, rtol=1e-2, atol=1e-2), max_err

    print("KERNEL_OK")
</pallas_src>

<mosaic_0001>
module attributes {stable_mosaic.version = 11 : i64} {
  func.func @_conv_stats_kernel(%arg0: i32, %arg1: i32, %arg2: memref<2x2x72x128xbf16, #tpu.memory_space<vmem>>, %arg3: memref<3x128x128xbf16, #tpu.memory_space<vmem>>, %arg4: memref<2x64x128xbf16, #tpu.memory_space<vmem>>, %arg5: memref<1x1x4x128xf32, #tpu.memory_space<vmem>>, %arg6: memref<64x128xf32, #tpu.memory_space<vmem>>) attributes {dimension_semantics = [#tpu.dimension_semantics<parallel>, #tpu.dimension_semantics<parallel>], iteration_bounds = array<i64: 1, 1>, scalar_prefetch = 0 : i64, scratch_operands = 1 : i64, tpu.core_type = #tpu.core_type<tc>, window_params = [{transform_indices = @transform_0, window_bounds = array<i64: 2, 2, 72, 128>}, {pipeline_mode = #tpu.pipeline_mode<synchronous>, transform_indices = @transform_1, window_bounds = array<i64: 3, 128, 128>}, {transform_indices = @transform_2, window_bounds = array<i64: 2, 64, 128>}, {transform_indices = @transform_3, window_bounds = array<i64: 1, 1, 4, 128>}]} {
    %c8_i32 = arith.constant 8 : i32
    %0 = arith.muli %arg1, %c8_i32 : i32
    %c0_i32 = arith.constant 0 : i32
    %1 = arith.addi %0, %c0_i32 : i32
    %c8_i32_0 = arith.constant 8 : i32
    %2 = arith.muli %1, %c8_i32_0 : i32
    %3 = tpu.assume_multiple %2, 8 : i32
    %c0 = arith.constant 0 : index
    %c0_1 = arith.constant 0 : index
    %4 = arith.index_cast %3 : i32 to index
    %c0_2 = arith.constant 0 : index
    %5 = vector.load %arg2[%c0, %c0_1, %4, %c0_2] : memref<2x2x72x128xbf16, #tpu.memory_space<vmem>>, vector<1x1x64x128xbf16>
    %6 = vector.shape_cast %5 : vector<1x1x64x128xbf16> to vector<64x128xbf16>
    %c0_3 = arith.constant 0 : index
    %c0_4 = arith.constant 0 : index
    %c0_5 = arith.constant 0 : index
    %7 = vector.load %arg3[%c0_3, %c0_4, %c0_5] : memref<3x128x128xbf16, #tpu.memory_space<vmem>>, vector<1x128x128xbf16>
    %8 = vector.shape_cast %7 : vector<1x128x128xbf16> to vector<128x128xbf16>
    %cst = arith.constant dense<0.000000e+00> : vector<64x128xf32>
    %9 = tpu.matmul %6, %8, %cst {dimension_numbers = #tpu.dot_dimension_numbers<[1], [0], [0], [1], [0, 0, 1, 1], [], []>} : vector<64x128xbf16>, vector<128x128xbf16>, vector<64x128xf32> -> vector<64x128xf32>
    %c0_6 = arith.constant 0 : index
    %c0_7 = arith.constant 0 : index
    %10 = vector.load %arg6[%c0_6, %c0_7] : memref<64x128xf32, #tpu.memory_space<vmem>>, vector<64x128xf32>
    tpu.vector_store %arg6[%c0_6, %c0_7], %9 {strides = array<i32>} : memref<64x128xf32, #tpu.memory_space<vmem>>, vector<64x128xf32>,
    %c8_i32_8 = arith.constant 8 : i32
    %11 = arith.muli %arg1, %c8_i32_8 : i32
    %c0_i32_9 = arith.constant 0 : i32
    %12 = arith.addi %11, %c0_i32_9 : i32
    %c8_i32_10 = arith.constant 8 : i32
    %13 = arith.muli %12, %c8_i32_10 : i32
    %14 = tpu.assume_multiple %13, 8 : i32
    %c0_11 = arith.constant 0 : index
    %c1 = arith.constant 1 : index
    %15 = arith.index_cast %14 : i32 to index
    %c0_12 = arith.constant 0 : index
    %16 = vector.load %arg2[%c0_11, %c1, %15, %c0_12] : memref<2x2x72x128xbf16, #tpu.memory_space<vmem>>, vector<1x1x64x128xbf16>
    %17 = vector.shape_cast %16 : vector<1x1x64x128xbf16> to vector<64x128xbf16>
    %c1_13 = arith.constant 1 : index
    %c0_14 = arith.constant 0 : index
    %c0_15 = arith.constant 0 : index
    %18 = vector.load %arg3[%c1_13, %c0_14, %c0_15] : memref<3x128x128xbf16, #tpu.memory_space<vmem>>, vector<1x128x128xbf16>
    %19 = vector.shape_cast %18 : vector<1x128x128xbf16> to vector<128x128xbf16>
    %cst_16 = arith.constant dense<0.000000e+00> : vector<64x128xf32>
    %20 = tpu.matmul %17, %19, %cst_16 {dimension_numbers = #tpu.dot_dimension_numbers<[1], [0], [0], [1], [0, 0, 1, 1], [], []>} : vector<64x128xbf16>, vector<128x128xbf16>, vector<64x128xf32> -> vector<64x128xf32>
    %c0_17 = arith.constant 0 : index
    %c0_18 = arith.constant 0 : index
    %21 = vector.load %arg6[%c0_17, %c0_18] : memref<64x128xf32, #tpu.memory_space<vmem>>, vector<64x128xf32>
    %22 = arith.addf %21, %20 : vector<64x128xf32>
    %c0_19 = arith.constant 0 : index
    %c0_20 = arith.constant 0 : index
    %23 = vector.load %arg6[%c0_19, %c0_20] : memref<64x128xf32, #tpu.memory_space<vmem>>, vector<64x128xf32>
    tpu.vector_store %arg6[%c0_19, %c0_20], %22 {strides = array<i32>} : memref<64x128xf32, #tpu.memory_space<vmem>>, vector<64x128xf32>,
    %c8_i32_21 = arith.constant 8 : i32
    %24 = arith.muli %arg1, %c8_i32_21 : i32
    %c1_i32 = arith.constant 1 : i32
    %25 = arith.addi %24, %c1_i32 : i32
    %c8_i32_22 = arith.constant 8 : i32
    %26 = arith.muli %25, %c8_i32_22 : i32
    %27 = tpu.assume_multiple %26, 8 : i32
    %c0_23 = arith.constant 0 : index
    %c0_24 = arith.constant 0 : index
    %28 = arith.index_cast %27 : i32 to index
    %c0_25 = arith.constant 0 : index
    %29 = vector.load %arg2[%c0_23, %c0_24, %28, %c0_25] : memref<2x2x72x128xbf16, #tpu.memory_space<vmem>>, vector<1x1x64x128xbf16>
    %30 = vector.shape_cast %29 : vector<1x1x64x128xbf16> to vector<64x128xbf16>
    %c2 = arith.constant 2 : index
    %c0_26 = arith.constant 0 : index
    %c0_27 = arith.constant 0 : index
    %31 = vector.load %arg3[%c2, %c0_26, %c0_27] : memref<3x128x128xbf16, #tpu.memory_space<vmem>>, vector<1x128x128xbf16>
    %32 = vector.shape_cast %31 : vector<1x128x128xbf16> to vector<128x128xbf16>
    %cst_28 = arith.constant dense<0.000000e+00> : vector<64x128xf32>
    %33 = tpu.matmul %30, %32, %cst_28 {dimension_numbers = #tpu.dot_dimension_numbers<[1], [0], [0], [1], [0, 0, 1, 1], [], []>} : vector<64x128xbf16>, vector<128x128xbf16>, vector<64x128xf32> -> vector<64x128xf32>
    %c0_29 = arith.constant 0 : index
    %c0_30 = arith.constant 0 : index
    %34 = vector.load %arg6[%c0_29, %c0_30] : memref<64x128xf32, #tpu.memory_space<vmem>>, vector<64x128xf32>
    %35 = arith.addf %34, %33 : vector<64x128xf32>
    %c0_31 = arith.constant 0 : index
    %c0_32 = arith.constant 0 : index
    %36 = vector.load %arg6[%c0_31, %c0_32] : memref<64x128xf32, #tpu.memory_space<vmem>>, vector<64x128xf32>
    tpu.vector_store %arg6[%c0_31, %c0_32], %35 {strides = array<i32>} : memref<64x128xf32, #tpu.memory_space<vmem>>, vector<64x128xf32>,
    %c0_33 = arith.constant 0 : index
    %c0_34 = arith.constant 0 : index
    %37 = vector.load %arg6[%c0_33, %c0_34] : memref<64x128xf32, #tpu.memory_space<vmem>>, vector<64x128xf32>
    %38 = arith.truncf %37 : vector<64x128xf32> to vector<64x128xbf16>
    %c0_35 = arith.constant 0 : index
    %c0_36 = arith.constant 0 : index
    %c0_37 = arith.constant 0 : index
    %39 = vector.load %arg4[%c0_35, %c0_36, %c0_37] : memref<2x64x128xbf16, #tpu.memory_space<vmem>>, vector<1x64x128xbf16>
    %40 = vector.shape_cast %39 : vector<1x64x128xbf16> to vector<64x128xbf16>
    %41 = vector.shape_cast %38 : vector<64x128xbf16> to vector<1x64x128xbf16>
    tpu.vector_store %arg4[%c0_35, %c0_36, %c0_37], %41 {strides = array<i32>} : memref<2x64x128xbf16, #tpu.memory_space<vmem>>, vector<1x64x128xbf16>,
    %cst_38 = arith.constant dense<0.000000e+00> : vector<128xf32>
    %42 = vector.multi_reduction <add>, %37, %cst_38 [0] : vector<64x128xf32> to vector<128xf32>
    %43 = vector.shape_cast %42 : vector<128xf32> to vector<1x128xf32>
    %cst_39 = arith.constant 1.562500e-02 : f32
    %44 = vector.broadcast %cst_39 : f32 to vector<1x128xf32>
    %45 = arith.mulf %43, %44 : vector<1x128xf32>
    %46 = vector.broadcast %45 : vector<1x128xf32> to vector<64x128xf32>
    %47 = arith.subf %37, %46 : vector<64x128xf32>
    %c0_40 = arith.constant 0 : index
    %c0_41 = arith.constant 0 : index
    %c0_42 = arith.constant 0 : index
    %c0_43 = arith.constant 0 : index
    %48 = vector.load %arg5[%c0_40, %c0_41, %c0_42, %c0_43] : memref<1x1x4x128xf32, #tpu.memory_space<vmem>>, vector<1x1x1x128xf32>
    %49 = vector.shape_cast %48 : vector<1x1x1x128xf32> to vector<1x128xf32>
    %50 = vector.shape_cast %43 : vector<1x128xf32> to vector<1x1x1x128xf32>
    tpu.vector_store %arg5[%c0_40, %c0_41, %c0_42, %c0_43], %50 {strides = array<i32>} : memref<1x1x4x128xf32, #tpu.memory_space<vmem>>, vector<1x1x1x128xf32>,
    %51 = arith.mulf %47, %47 : vector<64x128xf32>
    %cst_44 = arith.constant dense<0.000000e+00> : vector<128xf32>
    %52 = vector.multi_reduction <add>, %51, %cst_44 [0] : vector<64x128xf32> to vector<128xf32>
    %53 = vector.shape_cast %52 : vector<128xf32> to vector<1x128xf32>
    %c0_45 = arith.constant 0 : index
    %c0_46 = arith.constant 0 : index
    %c1_47 = arith.constant 1 : index
    %c0_48 = arith.constant 0 : index
    %54 = vector.load %arg5[%c0_45, %c0_46, %c1_47, %c0_48] : memref<1x1x4x128xf32, #tpu.memory_space<vmem>>, vector<1x1x1x128xf32>
    %55 = vector.shape_cast %54 : vector<1x1x1x128xf32> to vector<1x128xf32>
    %56 = vector.shape_cast %53 : vector<1x128xf32> to vector<1x1x1x128xf32>
    tpu.vector_store %arg5[%c0_45, %c0_46, %c1_47, %c0_48], %56 {strides = array<i32>} : memref<1x1x4x128xf32, #tpu.memory_space<vmem>>, vector<1x1x1x128xf32>,
    %c8_i32_49 = arith.constant 8 : i32
    %57 = arith.muli %arg1, %c8_i32_49 : i32
    %c0_i32_50 = arith.constant 0 : i32
    %58 = arith.addi %57, %c0_i32_50 : i32
    %c8_i32_51 = arith.constant 8 : i32
    %59 = arith.muli %58, %c8_i32_51 : i32
    %60 = tpu.assume_multiple %59, 8 : i32
    %c1_52 = arith.constant 1 : index
    %c0_53 = arith.constant 0 : index
    %61 = arith.index_cast %60 : i32 to index
    %c0_54 = arith.constant 0 : index
    %62 = vector.load %arg2[%c1_52, %c0_53, %61, %c0_54] : memref<2x2x72x128xbf16, #tpu.memory_space<vmem>>, vector<1x1x64x128xbf16>
    %63 = vector.shape_cast %62 : vector<1x1x64x128xbf16> to vector<64x128xbf16>
    %c0_55 = arith.constant 0 : index
    %c0_56 = arith.constant 0 : index
    %c0_57 = arith.constant 0 : index
    %64 = vector.load %arg3[%c0_55, %c0_56, %c0_57] : memref<3x128x128xbf16, #tpu.memory_space<vmem>>, vector<1x128x128xbf16>
    %65 = vector.shape_cast %64 : vector<1x128x128xbf16> to vector<128x128xbf16>
    %cst_58 = arith.constant dense<0.000000e+00> : vector<64x128xf32>
    %66 = tpu.matmul %63, %65, %cst_58 {dimension_numbers = #tpu.dot_dimension_numbers<[1], [0], [0], [1], [0, 0, 1, 1], [], []>} : vector<64x128xbf16>, vector<128x128xbf16>, vector<64x128xf32> -> vector<64x128xf32>
    %c0_59 = arith.constant 0 : index
    %c0_60 = arith.constant 0 : index
    %67 = vector.load %arg6[%c0_59, %c0_60] : memref<64x128xf32, #tpu.memory_space<vmem>>, vector<64x128xf32>
    tpu.vector_store %arg6[%c0_59, %c0_60], %66 {strides = array<i32>} : memref<64x128xf32, #tpu.memory_space<vmem>>, vector<64x128xf32>,
    %c8_i32_61 = arith.constant 8 : i32
    %68 = arith.muli %arg1, %c8_i32_61 : i32
    %c0_i32_62 = arith.constant 0 : i32
    %69 = arith.addi %68, %c0_i32_62 : i32
    %c8_i32_63 = arith.constant 8 : i32
    %70 = arith.muli %69, %c8_i32_63 : i32
    %71 = tpu.assume_multiple %70, 8 : i32
    %c1_64 = arith.constant 1 : index
    %c1_65 = arith.constant 1 : index
    %72 = arith.index_cast %71 : i32 to index
    %c0_66 = arith.constant 0 : index
    %73 = vector.load %arg2[%c1_64, %c1_65, %72, %c0_66] : memref<2x2x72x128xbf16, #tpu.memory_space<vmem>>, vector<1x1x64x128xbf16>
    %74 = vector.shape_cast %73 : vector<1x1x64x128xbf16> to vector<64x128xbf16>
    %c1_67 = arith.constant 1 : index
    %c0_68 = arith.constant 0 : index
    %c0_69 = arith.constant 0 : index
    %75 = vector.load %arg3[%c1_67, %c0_68, %c0_69] : memref<3x128x128xbf16, #tpu.memory_space<vmem>>, vector<1x128x128xbf16>
    %76 = vector.shape_cast %75 : vector<1x128x128xbf16> to vector<128x128xbf16>
    %cst_70 = arith.constant dense<0.000000e+00> : vector<64x128xf32>
    %77 = tpu.matmul %74, %76, %cst_70 {dimension_numbers = #tpu.dot_dimension_numbers<[1], [0], [0], [1], [0, 0, 1, 1], [], []>} : vector<64x128xbf16>, vector<128x128xbf16>, vector<64x128xf32> -> vector<64x128xf32>
    %c0_71 = arith.constant 0 : index
    %c0_72 = arith.constant 0 : index
    %78 = vector.load %arg6[%c0_71, %c0_72] : memref<64x128xf32, #tpu.memory_space<vmem>>, vector<64x128xf32>
    %79 = arith.addf %78, %77 : vector<64x128xf32>
    %c0_73 = arith.constant 0 : index
    %c0_74 = arith.constant 0 : index
    %80 = vector.load %arg6[%c0_73, %c0_74] : memref<64x128xf32, #tpu.memory_space<vmem>>, vector<64x128xf32>
    tpu.vector_store %arg6[%c0_73, %c0_74], %79 {strides = array<i32>} : memref<64x128xf32, #tpu.memory_space<vmem>>, vector<64x128xf32>,
    %c8_i32_75 = arith.constant 8 : i32
    %81 = arith.muli %arg1, %c8_i32_75 : i32
    %c1_i32_76 = arith.constant 1 : i32
    %82 = arith.addi %81, %c1_i32_76 : i32
    %c8_i32_77 = arith.constant 8 : i32
    %83 = arith.muli %82, %c8_i32_77 : i32
    %84 = tpu.assume_multiple %83, 8 : i32
    %c1_78 = arith.constant 1 : index
    %c0_79 = arith.constant 0 : index
    %85 = arith.index_cast %84 : i32 to index
    %c0_80 = arith.constant 0 : index
    %86 = vector.load %arg2[%c1_78, %c0_79, %85, %c0_80] : memref<2x2x72x128xbf16, #tpu.memory_space<vmem>>, vector<1x1x64x128xbf16>
    %87 = vector.shape_cast %86 : vector<1x1x64x128xbf16> to vector<64x128xbf16>
    %c2_81 = arith.constant 2 : index
    %c0_82 = arith.constant 0 : index
    %c0_83 = arith.constant 0 : index
    %88 = vector.load %arg3[%c2_81, %c0_82, %c0_83] : memref<3x128x128xbf16, #tpu.memory_space<vmem>>, vector<1x128x128xbf16>
    %89 = vector.shape_cast %88 : vector<1x128x128xbf16> to vector<128x128xbf16>
    %cst_84 = arith.constant dense<0.000000e+00> : vector<64x128xf32>
    %90 = tpu.matmul %87, %89, %cst_84 {dimension_numbers = #tpu.dot_dimension_numbers<[1], [0], [0], [1], [0, 0, 1, 1], [], []>} : vector<64x128xbf16>, vector<128x128xbf16>, vector<64x128xf32> -> vector<64x128xf32>
    %c0_85 = arith.constant 0 : index
    %c0_86 = arith.constant 0 : index
    %91 = vector.load %arg6[%c0_85, %c0_86] : memref<64x128xf32, #tpu.memory_space<vmem>>, vector<64x128xf32>
    %92 = arith.addf %91, %90 : vector<64x128xf32>
    %c0_87 = arith.constant 0 : index
    %c0_88 = arith.constant 0 : index
    %93 = vector.load %arg6[%c0_87, %c0_88] : memref<64x128xf32, #tpu.memory_space<vmem>>, vector<64x128xf32>
    tpu.vector_store %arg6[%c0_87, %c0_88], %92 {strides = array<i32>} : memref<64x128xf32, #tpu.memory_space<vmem>>, vector<64x128xf32>,
    %c0_89 = arith.constant 0 : index
    %c0_90 = arith.constant 0 : index
    %94 = vector.load %arg6[%c0_89, %c0_90] : memref<64x128xf32, #tpu.memory_space<vmem>>, vector<64x128xf32>
    %95 = arith.truncf %94 : vector<64x128xf32> to vector<64x128xbf16>
    %c1_91 = arith.constant 1 : index
    %c0_92 = arith.constant 0 : index
    %c0_93 = arith.constant 0 : index
    %96 = vector.load %arg4[%c1_91, %c0_92, %c0_93] : memref<2x64x128xbf16, #tpu.memory_space<vmem>>, vector<1x64x128xbf16>
    %97 = vector.shape_cast %96 : vector<1x64x128xbf16> to vector<64x128xbf16>
    %98 = vector.shape_cast %95 : vector<64x128xbf16> to vector<1x64x128xbf16>
    tpu.vector_store %arg4[%c1_91, %c0_92, %c0_93], %98 {strides = array<i32>} : memref<2x64x128xbf16, #tpu.memory_space<vmem>>, vector<1x64x128xbf16>,
    %cst_94 = arith.constant dense<0.000000e+00> : vector<128xf32>
    %99 = vector.multi_reduction <add>, %94, %cst_94 [0] : vector<64x128xf32> to vector<128xf32>
    %100 = vector.shape_cast %99 : vector<128xf32> to vector<1x128xf32>
    %cst_95 = arith.constant 1.562500e-02 : f32
    %101 = vector.broadcast %cst_95 : f32 to vector<1x128xf32>
    %102 = arith.mulf %100, %101 : vector<1x128xf32>
    %103 = vector.broadcast %102 : vector<1x128xf32> to vector<64x128xf32>
    %104 = arith.subf %94, %103 : vector<64x128xf32>
    %c0_96 = arith.constant 0 : index
    %c0_97 = arith.constant 0 : index
    %c2_98 = arith.constant 2 : index
    %c0_99 = arith.constant 0 : index
    %105 = vector.load %arg5[%c0_96, %c0_97, %c2_98, %c0_99] : memref<1x1x4x128xf32, #tpu.memory_space<vmem>>, vector<1x1x1x128xf32>
    %106 = vector.shape_cast %105 : vector<1x1x1x128xf32> to vector<1x128xf32>
    %107 = vector.shape_cast %100 : vector<1x128xf32> to vector<1x1x1x128xf32>
    tpu.vector_store %arg5[%c0_96, %c0_97, %c2_98, %c0_99], %107 {strides = array<i32>} : memref<1x1x4x128xf32, #tpu.memory_space<vmem>>, vector<1x1x1x128xf32>,
    %108 = arith.mulf %104, %104 : vector<64x128xf32>
    %cst_100 = arith.constant dense<0.000000e+00> : vector<128xf32>
    %109 = vector.multi_reduction <add>, %108, %cst_100 [0] : vector<64x128xf32> to vector<128xf32>
    %110 = vector.shape_cast %109 : vector<128xf32> to vector<1x128xf32>
    %c0_101 = arith.constant 0 : index
    %c0_102 = arith.constant 0 : index
    %c3 = arith.constant 3 : index
    %c0_103 = arith.constant 0 : index
    %111 = vector.load %arg5[%c0_101, %c0_102, %c3, %c0_103] : memref<1x1x4x128xf32, #tpu.memory_space<vmem>>, vector<1x1x1x128xf32>
    %112 = vector.shape_cast %111 : vector<1x1x1x128xf32> to vector<1x128xf32>
    %113 = vector.shape_cast %110 : vector<1x128xf32> to vector<1x1x1x128xf32>
    tpu.vector_store %arg5[%c0_101, %c0_102, %c3, %c0_103], %113 {strides = array<i32>} : memref<1x1x4x128xf32, #tpu.memory_space<vmem>>, vector<1x1x1x128xf32>,
    return
  }
  func.func @transform_0(%arg0: i32, %arg1: i32) -> (i32, i32, i32, i32) {
    %c0_i32 = arith.constant 0 : i32
    %c0_i32_0 = arith.constant 0 : i32
    %c0_i32_1 = arith.constant 0 : i32
    %c0_i32_2 = arith.constant 0 : i32
    return %arg0, %c0_i32, %c0_i32_0, %c0_i32_1 : i32, i32, i32, i32
  }
  func.func @transform_1(%arg0: i32, %arg1: i32) -> (i32, i32, i32) {
    %c0_i32 = arith.constant 0 : i32
    %c0_i32_0 = arith.constant 0 : i32
    %c0_i32_1 = arith.constant 0 : i32
    %c0_i32_2 = arith.constant 0 : i32
    return %c0_i32, %c0_i32_0, %c0_i32_1 : i32, i32, i32
  }
  func.func @transform_2(%arg0: i32, %arg1: i32) -> (i32, i32, i32) {
    %c0_i32 = arith.constant 0 : i32
    %c0_i32_0 = arith.constant 0 : i32
    return %arg0, %arg1, %c0_i32 : i32, i32, i32
  }
  func.func @transform_3(%arg0: i32, %arg1: i32) -> (i32, i32, i32, i32) {
    %c0_i32 = arith.constant 0 : i32
    %c0_i32_0 = arith.constant 0 : i32
    %c0_i32_1 = arith.constant 0 : i32
    return %arg0, %arg1, %c0_i32, %c0_i32_0 : i32, i32, i32, i32
  }
}

module attributes {stable_mosaic.version = 11 : i64} {
  func.func @_bn_act_kernel(%arg0: i32, %arg1: memref<128x128xbf16, #tpu.memory_space<vmem>>, %arg2: memref<1x128xf32, #tpu.memory_space<vmem>>, %arg3: memref<1x128xf32, #tpu.memory_space<vmem>>, %arg4: memref<128x128xf32, #tpu.memory_space<vmem>>) attributes {dimension_semantics = [#tpu.dimension_semantics<parallel>], iteration_bounds = array<i64: 1>, scalar_prefetch = 0 : i64, scratch_operands = 0 : i64, tpu.core_type = #tpu.core_type<tc>, window_params = [{transform_indices = @transform_0, window_bounds = array<i64: 128, 128>}, {pipeline_mode = #tpu.pipeline_mode<synchronous>, transform_indices = @transform_1, window_bounds = array<i64: 1, 128>}, {pipeline_mode = #tpu.pipeline_mode<synchronous>, transform_indices = @transform_2, window_bounds = array<i64: 1, 128>}, {transform_indices = @transform_3, window_bounds = array<i64: 128, 128>}]} {
    %c0 = arith.constant 0 : index
    %c0_0 = arith.constant 0 : index
    %0 = vector.load %arg1[%c0, %c0_0] : memref<128x128xbf16, #tpu.memory_space<vmem>>, vector<128x128xbf16>
    %1 = arith.extf %0 : vector<128x128xbf16> to vector<128x128xf32>
    %c0_1 = arith.constant 0 : index
    %c0_2 = arith.constant 0 : index
    %2 = vector.load %arg2[%c0_1, %c0_2] : memref<1x128xf32, #tpu.memory_space<vmem>>, vector<1x128xf32>
    %3 = vector.broadcast %2 : vector<1x128xf32> to vector<128x128xf32>
    %4 = arith.mulf %1, %3 : vector<128x128xf32>
    %c0_3 = arith.constant 0 : index
    %c0_4 = arith.constant 0 : index
    %5 = vector.load %arg3[%c0_3, %c0_4] : memref<1x128xf32, #tpu.memory_space<vmem>>, vector<1x128xf32>
    %6 = vector.broadcast %5 : vector<1x128xf32> to vector<128x128xf32>
    %7 = arith.addf %4, %6 : vector<128x128xf32>
    %c0_5 = arith.constant 0 : index
    %c0_6 = arith.constant 0 : index
    %8 = vector.load %arg4[%c0_5, %c0_6] : memref<128x128xf32, #tpu.memory_space<vmem>>, vector<128x128xf32>
    tpu.vector_store %arg4[%c0_5, %c0_6], %7 {strides = array<i32>} : memref<128x128xf32, #tpu.memory_space<vmem>>, vector<128x128xf32>,
    return
  }
  func.func @transform_0(%arg0: i32) -> (i32, i32) {
    %c0_i32 = arith.constant 0 : i32
    %c0_i32_0 = arith.constant 0 : i32
    return %arg0, %c0_i32 : i32, i32
  }
  func.func @transform_1(%arg0: i32) -> (i32, i32) {
    %c0_i32 = arith.constant 0 : i32
    %c0_i32_0 = arith.constant 0 : i32
    %c0_i32_1 = arith.constant 0 : i32
    return %c0_i32, %c0_i32_0 : i32, i32
  }
  func.func @transform_2(%arg0: i32) -> (i32, i32) {
    %c0_i32 = arith.constant 0 : i32
    %c0_i32_0 = arith.constant 0 : i32
    %c0_i32_1 = arith.constant 0 : i32
    return %c0_i32, %c0_i32_0 : i32, i32
  }
  func.func @transform_3(%arg0: i32) -> (i32, i32) {
    %c0_i32 = arith.constant 0 : i32
    %c0_i32_0 = arith.constant 0 : i32
    return %arg0, %c0_i32 : i32, i32
  }
}

module attributes {stable_mosaic.version = 11 : i64} {
  func.func @_conv_stats_kernel(%arg0: i32, %arg1: i32, %arg2: memref<2x1x80x128xbf16, #tpu.memory_space<vmem>>, %arg3: memref<3x128x128xbf16, #tpu.memory_space<vmem>>, %arg4: memref<2x64x128xbf16, #tpu.memory_space<vmem>>, %arg5: memref<1x1x4x128xf32, #tpu.memory_space<vmem>>, %arg6: memref<64x128xf32, #tpu.memory_space<vmem>>) attributes {dimension_semantics = [#tpu.dimension_semantics<parallel>, #tpu.dimension_semantics<parallel>], iteration_bounds = array<i64: 1, 1>, scalar_prefetch = 0 : i64, scratch_operands = 1 : i64, tpu.core_type = #tpu.core_type<tc>, window_params = [{transform_indices = @transform_0, window_bounds = array<i64: 2, 1, 80, 128>}, {pipeline_mode = #tpu.pipeline_mode<synchronous>, transform_indices = @transform_1, window_bounds = array<i64: 3, 128, 128>}, {transform_indices = @transform_2, window_bounds = array<i64: 2, 64, 128>}, {transform_indices = @transform_3, window_bounds = array<i64: 1, 1, 4, 128>}]} {
    %c8_i32 = arith.constant 8 : i32
    %0 = arith.muli %arg1, %c8_i32 : i32
    %c0_i32 = arith.constant 0 : i32
    %1 = arith.addi %0, %c0_i32 : i32
    %c8_i32_0 = arith.constant 8 : i32
    %2 = arith.muli %1, %c8_i32_0 : i32
    %3 = tpu.assume_multiple %2, 8 : i32
    %c0 = arith.constant 0 : index
    %c0_1 = arith.constant 0 : index
    %4 = arith.index_cast %3 : i32 to index
    %c0_2 = arith.constant 0 : index
    %5 = vector.load %arg2[%c0, %c0_1, %4, %c0_2] : memref<2x1x80x128xbf16, #tpu.memory_space<vmem>>, vector<1x1x64x128xbf16>
    %6 = vector.shape_cast %5 : vector<1x1x64x128xbf16> to vector<64x128xbf16>
    %c0_3 = arith.constant 0 : index
    %c0_4 = arith.constant 0 : index
    %c0_5 = arith.constant 0 : index
    %7 = vector.load %arg3[%c0_3, %c0_4, %c0_5] : memref<3x128x128xbf16, #tpu.memory_space<vmem>>, vector<1x128x128xbf16>
    %8 = vector.shape_cast %7 : vector<1x128x128xbf16> to vector<128x128xbf16>
    %cst = arith.constant dense<0.000000e+00> : vector<64x128xf32>
    %9 = tpu.matmul %6, %8, %cst {dimension_numbers = #tpu.dot_dimension_numbers<[1], [0], [0], [1], [0, 0, 1, 1], [], []>} : vector<64x128xbf16>, vector<128x128xbf16>, vector<64x128xf32> -> vector<64x128xf32>
    %c0_6 = arith.constant 0 : index
    %c0_7 = arith.constant 0 : index
    %10 = vector.load %arg6[%c0_6, %c0_7] : memref<64x128xf32, #tpu.memory_space<vmem>>, vector<64x128xf32>
    tpu.vector_store %arg6[%c0_6, %c0_7], %9 {strides = array<i32>} : memref<64x128xf32, #tpu.memory_space<vmem>>, vector<64x128xf32>,
    %c8_i32_8 = arith.constant 8 : i32
    %11 = arith.muli %arg1, %c8_i32_8 : i32
    %c1_i32 = arith.constant 1 : i32
    %12 = arith.addi %11, %c1_i32 : i32
    %c8_i32_9 = arith.constant 8 : i32
    %13 = arith.muli %12, %c8_i32_9 : i32
    %14 = tpu.assume_multiple %13, 8 : i32
    %c0_10 = arith.constant 0 : index
    %c0_11 = arith.constant 0 : index
    %15 = arith.index_cast %14 : i32 to index
    %c0_12 = arith.constant 0 : index
    %16 = vector.load %arg2[%c0_10, %c0_11, %15, %c0_12] : memref<2x1x80x128xbf16, #tpu.memory_space<vmem>>, vector<1x1x64x128xbf16>
    %17 = vector.shape_cast %16 : vector<1x1x64x128xbf16> to vector<64x128xbf16>
    %c1 = arith.constant 1 : index
    %c0_13 = arith.constant 0 : index
    %c0_14 = arith.constant 0 : index
    %18 = vector.load %arg3[%c1, %c0_13, %c0_14] : memref<3x128x128xbf16, #tpu.memory_space<vmem>>, vector<1x128x128xbf16>
    %19 = vector.shape_cast %18 : vector<1x128x128xbf16> to vector<128x128xbf16>
    %cst_15 = arith.constant dense<0.000000e+00> : vector<64x128xf32>
    %20 = tpu.matmul %17, %19, %cst_15 {dimension_numbers = #tpu.dot_dimension_numbers<[1], [0], [0], [1], [0, 0, 1, 1], [], []>} : vector<64x128xbf16>, vector<128x128xbf16>, vector<64x128xf32> -> vector<64x128xf32>
    %c0_16 = arith.constant 0 : index
    %c0_17 = arith.constant 0 : index
    %21 = vector.load %arg6[%c0_16, %c0_17] : memref<64x128xf32, #tpu.memory_space<vmem>>, vector<64x128xf32>
    %22 = arith.addf %21, %20 : vector<64x128xf32>
    %c0_18 = arith.constant 0 : index
    %c0_19 = arith.constant 0 : index
    %23 = vector.load %arg6[%c0_18, %c0_19] : memref<64x128xf32, #tpu.memory_space<vmem>>, vector<64x128xf32>
    tpu.vector_store %arg6[%c0_18, %c0_19], %22 {strides = array<i32>} : memref<64x128xf32, #tpu.memory_space<vmem>>, vector<64x128xf32>,
    %c8_i32_20 = arith.constant 8 : i32
    %24 = arith.muli %arg1, %c8_i32_20 : i32
    %c2_i32 = arith.constant 2 : i32
    %25 = arith.addi %24, %c2_i32 : i32
    %c8_i32_21 = arith.constant 8 : i32
    %26 = arith.muli %25, %c8_i32_21 : i32
    %27 = tpu.assume_multiple %26, 8 : i32
    %c0_22 = arith.constant 0 : index
    %c0_23 = arith.constant 0 : index
    %28 = arith.index_cast %27 : i32 to index
    %c0_24 = arith.constant 0 : index
    %29 = vector.load %arg2[%c0_22, %c0_23, %28, %c0_24] : memref<2x1x80x128xbf16, #tpu.memory_space<vmem>>, vector<1x1x64x128xbf16>
    %30 = vector.shape_cast %29 : vector<1x1x64x128xbf16> to vector<64x128xbf16>
    %c2 = arith.constant 2 : index
    %c0_25 = arith.constant 0 : index
    %c0_26 = arith.constant 0 : index
    %31 = vector.load %arg3[%c2, %c0_25, %c0_26] : memref<3x128x128xbf16, #tpu.memory_space<vmem>>, vector<1x128x128xbf16>
    %32 = vector.shape_cast %31 : vector<1x128x128xbf16> to vector<128x128xbf16>
    %cst_27 = arith.constant dense<0.000000e+00> : vector<64x128xf32>
    %33 = tpu.matmul %30, %32, %cst_27 {dimension_numbers = #tpu.dot_dimension_numbers<[1], [0], [0], [1], [0, 0, 1, 1], [], []>} : vector<64x128xbf16>, vector<128x128xbf16>, vector<64x128xf32> -> vector<64x128xf32>
    %c0_28 = arith.constant 0 : index
    %c0_29 = arith.constant 0 : index
    %34 = vector.load %arg6[%c0_28, %c0_29] : memref<64x128xf32, #tpu.memory_space<vmem>>, vector<64x128xf32>
    %35 = arith.addf %34, %33 : vector<64x128xf32>
    %c0_30 = arith.constant 0 : index
    %c0_31 = arith.constant 0 : index
    %36 = vector.load %arg6[%c0_30, %c0_31] : memref<64x128xf32, #tpu.memory_space<vmem>>, vector<64x128xf32>
    tpu.vector_store %arg6[%c0_30, %c0_31], %35 {strides = array<i32>} : memref<64x128xf32, #tpu.memory_space<vmem>>, vector<64x128xf32>,
    %c0_32 = arith.constant 0 : index
    %c0_33 = arith.constant 0 : index
    %37 = vector.load %arg6[%c0_32, %c0_33] : memref<64x128xf32, #tpu.memory_space<vmem>>, vector<64x128xf32>
    %38 = arith.truncf %37 : vector<64x128xf32> to vector<64x128xbf16>
    %c0_34 = arith.constant 0 : index
    %c0_35 = arith.constant 0 : index
    %c0_36 = arith.constant 0 : index
    %39 = vector.load %arg4[%c0_34, %c0_35, %c0_36] : memref<2x64x128xbf16, #tpu.memory_space<vmem>>, vector<1x64x128xbf16>
    %40 = vector.shape_cast %39 : vector<1x64x128xbf16> to vector<64x128xbf16>
    %41 = vector.shape_cast %38 : vector<64x128xbf16> to vector<1x64x128xbf16>
    tpu.vector_store %arg4[%c0_34, %c0_35, %c0_36], %41 {strides = array<i32>} : memref<2x64x128xbf16, #tpu.memory_space<vmem>>, vector<1x64x128xbf16>,
    %cst_37 = arith.constant dense<0.000000e+00> : vector<128xf32>
    %42 = vector.multi_reduction <add>, %37, %cst_37 [0] : vector<64x128xf32> to vector<128xf32>
    %43 = vector.shape_cast %42 : vector<128xf32> to vector<1x128xf32>
    %cst_38 = arith.constant 1.562500e-02 : f32
    %44 = vector.broadcast %cst_38 : f32 to vector<1x128xf32>
    %45 = arith.mulf %43, %44 : vector<1x128xf32>
    %46 = vector.broadcast %45 : vector<1x128xf32> to vector<64x128xf32>
    %47 = arith.subf %37, %46 : vector<64x128xf32>
    %c0_39 = arith.constant 0 : index
    %c0_40 = arith.constant 0 : index
    %c0_41 = arith.constant 0 : index
    %c0_42 = arith.constant 0 : index
    %48 = vector.load %arg5[%c0_39, %c0_40, %c0_41, %c0_42] : memref<1x1x4x128xf32, #tpu.memory_space<vmem>>, vector<1x1x1x128xf32>
    %49 = vector.shape_cast %48 : vector<1x1x1x128xf32> to vector<1x128xf32>
    %50 = vector.shape_cast %43 : vector<1x128xf32> to vector<1x1x1x128xf32>
    tpu.vector_store %arg5[%c0_39, %c0_40, %c0_41, %c0_42], %50 {strides = array<i32>} : memref<1x1x4x128xf32, #tpu.memory_space<vmem>>, vector<1x1x1x128xf32>,
    %51 = arith.mulf %47, %47 : vector<64x128xf32>
    %cst_43 = arith.constant dense<0.000000e+00> : vector<128xf32>
    %52 = vector.multi_reduction <add>, %51, %cst_43 [0] : vector<64x128xf32> to vector<128xf32>
    %53 = vector.shape_cast %52 : vector<128xf32> to vector<1x128xf32>
    %c0_44 = arith.constant 0 : index
    %c0_45 = arith.constant 0 : index
    %c1_46 = arith.constant 1 : index
    %c0_47 = arith.constant 0 : index
    %54 = vector.load %arg5[%c0_44, %c0_45, %c1_46, %c0_47] : memref<1x1x4x128xf32, #tpu.memory_space<vmem>>, vector<1x1x1x128xf32>
    %55 = vector.shape_cast %54 : vector<1x1x1x128xf32> to vector<1x128xf32>
    %56 = vector.shape_cast %53 : vector<1x128xf32> to vector<1x1x1x128xf32>
    tpu.vector_store %arg5[%c0_44, %c0_45, %c1_46, %c0_47], %56 {strides = array<i32>} : memref<1x1x4x128xf32, #tpu.memory_space<vmem>>, vector<1x1x1x128xf32>,
    %c8_i32_48 = arith.constant 8 : i32
    %57 = arith.muli %arg1, %c8_i32_48 : i32
    %c0_i32_49 = arith.constant 0 : i32
    %58 = arith.addi %57, %c0_i32_49 : i32
    %c8_i32_50 = arith.constant 8 : i32
    %59 = arith.muli %58, %c8_i32_50 : i32
    %60 = tpu.assume_multiple %59, 8 : i32
    %c1_51 = arith.constant 1 : index
    %c0_52 = arith.constant 0 : index
    %61 = arith.index_cast %60 : i32 to index
    %c0_53 = arith.constant 0 : index
    %62 = vector.load %arg2[%c1_51, %c0_52, %61, %c0_53] : memref<2x1x80x128xbf16, #tpu.memory_space<vmem>>, vector<1x1x64x128xbf16>
    %63 = vector.shape_cast %62 : vector<1x1x64x128xbf16> to vector<64x128xbf16>
    %c0_54 = arith.constant 0 : index
    %c0_55 = arith.constant 0 : index
    %c0_56 = arith.constant 0 : index
    %64 = vector.load %arg3[%c0_54, %c0_55, %c0_56] : memref<3x128x128xbf16, #tpu.memory_space<vmem>>, vector<1x128x128xbf16>
    %65 = vector.shape_cast %64 : vector<1x128x128xbf16> to vector<128x128xbf16>
    %cst_57 = arith.constant dense<0.000000e+00> : vector<64x128xf32>
    %66 = tpu.matmul %63, %65, %cst_57 {dimension_numbers = #tpu.dot_dimension_numbers<[1], [0], [0], [1], [0, 0, 1, 1], [], []>} : vector<64x128xbf16>, vector<128x128xbf16>, vector<64x128xf32> -> vector<64x128xf32>
    %c0_58 = arith.constant 0 : index
    %c0_59 = arith.constant 0 : index
    %67 = vector.load %arg6[%c0_58, %c0_59] : memref<64x128xf32, #tpu.memory_space<vmem>>, vector<64x128xf32>
    tpu.vector_store %arg6[%c0_58, %c0_59], %66 {strides = array<i32>} : memref<64x128xf32, #tpu.memory_space<vmem>>, vector<64x128xf32>,
    %c8_i32_60 = arith.constant 8 : i32
    %68 = arith.muli %arg1, %c8_i32_60 : i32
    %c1_i32_61 = arith.constant 1 : i32
    %69 = arith.addi %68, %c1_i32_61 : i32
    %c8_i32_62 = arith.constant 8 : i32
    %70 = arith.muli %69, %c8_i32_62 : i32
    %71 = tpu.assume_multiple %70, 8 : i32
    %c1_63 = arith.constant 1 : index
    %c0_64 = arith.constant 0 : index
    %72 = arith.index_cast %71 : i32 to index
    %c0_65 = arith.constant 0 : index
    %73 = vector.load %arg2[%c1_63, %c0_64, %72, %c0_65] : memref<2x1x80x128xbf16, #tpu.memory_space<vmem>>, vector<1x1x64x128xbf16>
    %74 = vector.shape_cast %73 : vector<1x1x64x128xbf16> to vector<64x128xbf16>
    %c1_66 = arith.constant 1 : index
    %c0_67 = arith.constant 0 : index
    %c0_68 = arith.constant 0 : index
    %75 = vector.load %arg3[%c1_66, %c0_67, %c0_68] : memref<3x128x128xbf16, #tpu.memory_space<vmem>>, vector<1x128x128xbf16>
    %76 = vector.shape_cast %75 : vector<1x128x128xbf16> to vector<128x128xbf16>
    %cst_69 = arith.constant dense<0.000000e+00> : vector<64x128xf32>
    %77 = tpu.matmul %74, %76, %cst_69 {dimension_numbers = #tpu.dot_dimension_numbers<[1], [0], [0], [1], [0, 0, 1, 1], [], []>} : vector<64x128xbf16>, vector<128x128xbf16>, vector<64x128xf32> -> vector<64x128xf32>
    %c0_70 = arith.constant 0 : index
    %c0_71 = arith.constant 0 : index
    %78 = vector.load %arg6[%c0_70, %c0_71] : memref<64x128xf32, #tpu.memory_space<vmem>>, vector<64x128xf32>
    %79 = arith.addf %78, %77 : vector<64x128xf32>
    %c0_72 = arith.constant 0 : index
    %c0_73 = arith.constant 0 : index
    %80 = vector.load %arg6[%c0_72, %c0_73] : memref<64x128xf32, #tpu.memory_space<vmem>>, vector<64x128xf32>
    tpu.vector_store %arg6[%c0_72, %c0_73], %79 {strides = array<i32>} : memref<64x128xf32, #tpu.memory_space<vmem>>, vector<64x128xf32>,
    %c8_i32_74 = arith.constant 8 : i32
    %81 = arith.muli %arg1, %c8_i32_74 : i32
    %c2_i32_75 = arith.constant 2 : i32
    %82 = arith.addi %81, %c2_i32_75 : i32
    %c8_i32_76 = arith.constant 8 : i32
    %83 = arith.muli %82, %c8_i32_76 : i32
    %84 = tpu.assume_multiple %83, 8 : i32
    %c1_77 = arith.constant 1 : index
    %c0_78 = arith.constant 0 : index
    %85 = arith.index_cast %84 : i32 to index
    %c0_79 = arith.constant 0 : index
    %86 = vector.load %arg2[%c1_77, %c0_78, %85, %c0_79] : memref<2x1x80x128xbf16, #tpu.memory_space<vmem>>, vector<1x1x64x128xbf16>
    %87 = vector.shape_cast %86 : vector<1x1x64x128xbf16> to vector<64x128xbf16>
    %c2_80 = arith.constant 2 : index
    %c0_81 = arith.constant 0 : index
    %c0_82 = arith.constant 0 : index
    %88 = vector.load %arg3[%c2_80, %c0_81, %c0_82] : memref<3x128x128xbf16, #tpu.memory_space<vmem>>, vector<1x128x128xbf16>
    %89 = vector.shape_cast %88 : vector<1x128x128xbf16> to vector<128x128xbf16>
    %cst_83 = arith.constant dense<0.000000e+00> : vector<64x128xf32>
    %90 = tpu.matmul %87, %89, %cst_83 {dimension_numbers = #tpu.dot_dimension_numbers<[1], [0], [0], [1], [0, 0, 1, 1], [], []>} : vector<64x128xbf16>, vector<128x128xbf16>, vector<64x128xf32> -> vector<64x128xf32>
    %c0_84 = arith.constant 0 : index
    %c0_85 = arith.constant 0 : index
    %91 = vector.load %arg6[%c0_84, %c0_85] : memref<64x128xf32, #tpu.memory_space<vmem>>, vector<64x128xf32>
    %92 = arith.addf %91, %90 : vector<64x128xf32>
    %c0_86 = arith.constant 0 : index
    %c0_87 = arith.constant 0 : index
    %93 = vector.load %arg6[%c0_86, %c0_87] : memref<64x128xf32, #tpu.memory_space<vmem>>, vector<64x128xf32>
    tpu.vector_store %arg6[%c0_86, %c0_87], %92 {strides = array<i32>} : memref<64x128xf32, #tpu.memory_space<vmem>>, vector<64x128xf32>,
    %c0_88 = arith.constant 0 : index
    %c0_89 = arith.constant 0 : index
    %94 = vector.load %arg6[%c0_88, %c0_89] : memref<64x128xf32, #tpu.memory_space<vmem>>, vector<64x128xf32>
    %95 = arith.truncf %94 : vector<64x128xf32> to vector<64x128xbf16>
    %c1_90 = arith.constant 1 : index
    %c0_91 = arith.constant 0 : index
    %c0_92 = arith.constant 0 : index
    %96 = vector.load %arg4[%c1_90, %c0_91, %c0_92] : memref<2x64x128xbf16, #tpu.memory_space<vmem>>, vector<1x64x128xbf16>
    %97 = vector.shape_cast %96 : vector<1x64x128xbf16> to vector<64x128xbf16>
    %98 = vector.shape_cast %95 : vector<64x128xbf16> to vector<1x64x128xbf16>
    tpu.vector_store %arg4[%c1_90, %c0_91, %c0_92], %98 {strides = array<i32>} : memref<2x64x128xbf16, #tpu.memory_space<vmem>>, vector<1x64x128xbf16>,
    %cst_93 = arith.constant dense<0.000000e+00> : vector<128xf32>
    %99 = vector.multi_reduction <add>, %94, %cst_93 [0] : vector<64x128xf32> to vector<128xf32>
    %100 = vector.shape_cast %99 : vector<128xf32> to vector<1x128xf32>
    %cst_94 = arith.constant 1.562500e-02 : f32
    %101 = vector.broadcast %cst_94 : f32 to vector<1x128xf32>
    %102 = arith.mulf %100, %101 : vector<1x128xf32>
    %103 = vector.broadcast %102 : vector<1x128xf32> to vector<64x128xf32>
    %104 = arith.subf %94, %103 : vector<64x128xf32>
    %c0_95 = arith.constant 0 : index
    %c0_96 = arith.constant 0 : index
    %c2_97 = arith.constant 2 : index
    %c0_98 = arith.constant 0 : index
    %105 = vector.load %arg5[%c0_95, %c0_96, %c2_97, %c0_98] : memref<1x1x4x128xf32, #tpu.memory_space<vmem>>, vector<1x1x1x128xf32>
    %106 = vector.shape_cast %105 : vector<1x1x1x128xf32> to vector<1x128xf32>
    %107 = vector.shape_cast %100 : vector<1x128xf32> to vector<1x1x1x128xf32>
    tpu.vector_store %arg5[%c0_95, %c0_96, %c2_97, %c0_98], %107 {strides = array<i32>} : memref<1x1x4x128xf32, #tpu.memory_space<vmem>>, vector<1x1x1x128xf32>,
    %108 = arith.mulf %104, %104 : vector<64x128xf32>
    %cst_99 = arith.constant dense<0.000000e+00> : vector<128xf32>
    %109 = vector.multi_reduction <add>, %108, %cst_99 [0] : vector<64x128xf32> to vector<128xf32>
    %110 = vector.shape_cast %109 : vector<128xf32> to vector<1x128xf32>
    %c0_100 = arith.constant 0 : index
    %c0_101 = arith.constant 0 : index
    %c3 = arith.constant 3 : index
    %c0_102 = arith.constant 0 : index
    %111 = vector.load %arg5[%c0_100, %c0_101, %c3, %c0_102] : memref<1x1x4x128xf32, #tpu.memory_space<vmem>>, vector<1x1x1x128xf32>
    %112 = vector.shape_cast %111 : vector<1x1x1x128xf32> to vector<1x128xf32>
    %113 = vector.shape_cast %110 : vector<1x128xf32> to vector<1x1x1x128xf32>
    tpu.vector_store %arg5[%c0_100, %c0_101, %c3, %c0_102], %113 {strides = array<i32>} : memref<1x1x4x128xf32, #tpu.memory_space<vmem>>, vector<1x1x1x128xf32>,
    return
  }
  func.func @transform_0(%arg0: i32, %arg1: i32) -> (i32, i32, i32, i32) {
    %c0_i32 = arith.constant 0 : i32
    %c0_i32_0 = arith.constant 0 : i32
    %c0_i32_1 = arith.constant 0 : i32
    %c0_i32_2 = arith.constant 0 : i32
    return %arg0, %c0_i32, %c0_i32_0, %c0_i32_1 : i32, i32, i32, i32
  }
  func.func @transform_1(%arg0: i32, %arg1: i32) -> (i32, i32, i32) {
    %c0_i32 = arith.constant 0 : i32
    %c0_i32_0 = arith.constant 0 : i32
    %c0_i32_1 = arith.constant 0 : i32
    %c0_i32_2 = arith.constant 0 : i32
    return %c0_i32, %c0_i32_0, %c0_i32_1 : i32, i32, i32
  }
  func.func @transform_2(%arg0: i32, %arg1: i32) -> (i32, i32, i32) {
    %c0_i32 = arith.constant 0 : i32
    %c0_i32_0 = arith.constant 0 : i32
    return %arg0, %arg1, %c0_i32 : i32, i32, i32
  }
  func.func @transform_3(%arg0: i32, %arg1: i32) -> (i32, i32, i32, i32) {
    %c0_i32 = arith.constant 0 : i32
    %c0_i32_0 = arith.constant 0 : i32
    %c0_i32_1 = arith.constant 0 : i32
    return %arg0, %arg1, %c0_i32, %c0_i32_0 : i32, i32, i32, i32
  }
}

</mosaic_0001>

<bundles_post_ra>
// kernel: basic_transform.5
= control target key start
LH: loop header
LB: loop body
LE: loop exit
PB: predicated region body
PF: predicated region fallthrough
CT: control target
= control target key end

     0   :  { %s263_s0 = inlined_call_operand.vmem [shape: bf16[128,128], index: 0, kind: input, shape index: {}]   ;;  %s264_s1 = inlined_call_operand.vmem [shape: f32[1,128], index: 1, kind: input, shape index: {}]   ;;  %s265_s2 = inlined_call_operand.vmem [shape: f32[1,128], index: 2, kind: input, shape index: {}]   ;;  %s266_s3 = inlined_call_operand.vmem [shape: f32[128,128], index: 3, kind: output, shape index: {}]  }
   0x1   :  { %v107_v0 = vld [vmem:[%s263_s0] sm:$0xff]   ;;  %v138_v5 = vld [vmem:[%s263_s0 + $0x8] sm:$0xff]   ;;  %v139_v8 = vld [vmem:[%s263_s0 + $0x10] sm:$0xff]  }
   0x2   :  { %v145_v1 = vld [vmem:[%s264_s1] ss:$0 sm:$0xff]  ;;  %v108_v2 = vunpack.c.l.bf16 %v107_v0  ;;  %v109_v4 = vunpack.c.h.bf16 %v107_v0  ;;  %v112_v6 = vunpack.c.l.bf16 %v138_v5  ;;  %v113_v7 = vunpack.c.h.bf16 %v138_v5  ;;  %v140_v9 = vld [vmem:[%s263_s0 + $0x18] sm:$0xff]   ;;  %v142_v23 = vld [vmem:[%s263_s0 + $0x28] sm:$0xff]  }
   0x3   :  { %v176_v3 = vld [vmem:[%s265_s2] ss:$0 sm:$0xff]  ;;  %v116_v12 = vunpack.c.l.bf16 %v139_v8  ;;  %v117_v13 = vunpack.c.h.bf16 %v139_v8  ;;  %v120_v16 = vunpack.c.l.bf16 %v140_v9  ;;  %v121_v17 = vunpack.c.h.bf16 %v140_v9  ;;  %v143_v28 = vld [vmem:[%s263_s0 + $0x30] sm:$0xff]   ;;  %v144_v33 = vld [vmem:[%s263_s0 + $0x38] sm:$0xff]  }
   0x4   :  { %v50_v10 = vmul.f32 %v145_v1, %v108_v2  ;;  %v51_v11 = vmul.f32 %v145_v1, %v109_v4  ;;  %v52_v14 = vmul.f32 %v145_v1, %v112_v6  ;;  %v53_v15 = vmul.f32 %v145_v1, %v113_v7  ;;  %v141_v18 = vld [vmem:[%s263_s0 + $0x20] sm:$0xff]  }
   0x5   :  { %v54_v21 = vmul.f32 %v145_v1, %v116_v12  ;;  %v55_v22 = vmul.f32 %v145_v1, %v117_v13  ;;  %v56_v26 = vmul.f32 %v145_v1, %v120_v16  ;;  %v57_v27 = vmul.f32 %v145_v1, %v121_v17 }
   0x6   :  { %v70_v19 = vadd.f32 %v176_v3, %v50_v10  ;;  %v71_v20 = vadd.f32 %v176_v3, %v51_v11  ;;  %v72_v24 = vadd.f32 %v176_v3, %v52_v14  ;;  %v73_v25 = vadd.f32 %v176_v3, %v53_v15 }
   0x7   :  { %v74_v29 = vadd.f32 %v176_v3, %v54_v21  ;;  %v75_v30 = vadd.f32 %v176_v3, %v55_v22  ;;  %v124_v31 = vunpack.c.l.bf16 %v141_v18  ;;  %v125_v32 = vunpack.c.h.bf16 %v141_v18 }
   0x8   :  { %86 = vst [vmem:[%s266_s3] sm:$0xff] %v70_v19  ;;  %v76_v34 = vadd.f32 %v176_v3, %v56_v26  ;;  %v77_v35 = vadd.f32 %v176_v3, %v57_v27  ;;  %v128_v36 = vunpack.c.l.bf16 %v142_v23  ;;  %v129_v37 = vunpack.c.h.bf16 %v142_v23 }
   0x9   :  { %87 = vst [vmem:[%s266_s3 + $0x8] sm:$0xff] %v71_v20  ;;  %v58_v38 = vmul.f32 %v145_v1, %v124_v31  ;;  %v59_v39 = vmul.f32 %v145_v1, %v125_v32  ;;  %v132_v40 = vunpack.c.l.bf16 %v143_v28  ;;  %v133_v41 = vunpack.c.h.bf16 %v143_v28 }
   0xa   :  { %88 = vst [vmem:[%s266_s3 + $0x10] sm:$0xff] %v72_v24  ;;  %v60_v42 = vmul.f32 %v145_v1, %v128_v36  ;;  %v61_v43 = vmul.f32 %v145_v1, %v129_v37  ;;  %v136_v44 = vunpack.c.l.bf16 %v144_v33  ;;  %v137_v45 = vunpack.c.h.bf16 %v144_v33 }
   0xb   :  { %89 = vst [vmem:[%s266_s3 + $0x18] sm:$0xff] %v73_v25  ;;  %v78_v46 = vadd.f32 %v176_v3, %v58_v38  ;;  %v62_v47 = vmul.f32 %v145_v1, %v132_v40  ;;  %v79_v48 = vadd.f32 %v176_v3, %v59_v39  ;;  %v63_v49 = vmul.f32 %v145_v1, %v133_v41 }
   0xc   :  { %90 = vst [vmem:[%s266_s3 + $0x20] sm:$0xff] %v74_v29  ;;  %v80_v50 = vadd.f32 %v176_v3, %v60_v42  ;;  %v64_v51 = vmul.f32 %v145_v1, %v136_v44  ;;  %v81_v52 = vadd.f32 %v176_v3, %v61_v43  ;;  %v65_v53 = vmul.f32 %v145_v1, %v137_v45 }
   0xd   :  { %91 = vst [vmem:[%s266_s3 + $0x28] sm:$0xff] %v75_v30  ;;  %v82_v54 = vadd.f32 %v176_v3, %v62_v47  ;;  %v83_v55 = vadd.f32 %v176_v3, %v63_v49 }
   0xe   :  { %92 = vst [vmem:[%s266_s3 + $0x30] sm:$0xff] %v76_v34  ;;  %v84_v56 = vadd.f32 %v176_v3, %v64_v51  ;;  %v85_v57 = vadd.f32 %v176_v3, %v65_v53 }
   0xf   :  { %93 = vst [vmem:[%s266_s3 + $0x38] sm:$0xff] %v77_v35 }
  0x10   :  { %94 = vst [vmem:[%s266_s3 + $0x40] sm:$0xff] %v78_v46 }
  0x11   :  { %95 = vst [vmem:[%s266_s3 + $0x48] sm:$0xff] %v79_v48 }
  0x12   :  { %96 = vst [vmem:[%s266_s3 + $0x50] sm:$0xff] %v80_v50 }
  0x13   :  { %97 = vst [vmem:[%s266_s3 + $0x58] sm:$0xff] %v81_v52 }
  0x14   :  { %98 = vst [vmem:[%s266_s3 + $0x60] sm:$0xff] %v82_v54 }
  0x15   :  { %99 = vst [vmem:[%s266_s3 + $0x68] sm:$0xff] %v83_v55 }
  0x16   :  { %100 = vst [vmem:[%s266_s3 + $0x70] sm:$0xff] %v84_v56 }
  0x17   :  { %101 = vst [vmem:[%s266_s3 + $0x78] sm:$0xff] %v85_v57 }

// kernel: basic_transform.3
= control target key start
LH: loop header
LB: loop body
LE: loop exit
PB: predicated region body
PF: predicated region fallthrough
CT: control target
= control target key end

     0   :  { %s1944_s1 = inlined_call_operand.vmem [shape: bf16[3,128,128], index: 1, kind: input, shape index: {}]   ;;  %s1945_s0 = inlined_call_operand.vmem [shape: bf16[2,2,72,128], index: 0, kind: input, shape index: {}]   ;;  %s1946_s2 = inlined_call_operand.vmem [shape: bf16[2,64,128], index: 2, kind: output, shape index: {0}]   ;;  %s1947_s3 = inlined_call_operand.vmem [shape: f32[1,1,4,128], index: 3, kind: output, shape index: {1}]  }
   0x1   :  { %v1476_v0 = vld [vmem:[%s1944_s1 + $0x38] sm:$0xff]  ;;  %v1475_v2 = vld [vmem:[%s1944_s1 + $0x30] sm:$0xff]  ;;  %v1474_v4 = vld [vmem:[%s1944_s1 + $0x28] sm:$0xff] }
   0x2   :  { %v1488_v1 = vld [vmem:[%s1944_s1 + $0x78] sm:$0xff]  ;;  %114 = vmatpush.bf16.msra.mxu0 %v1476_v0  ;;  %1584 = vmatpush.bf16.msra.mxu2 %v1476_v0  ;;  %v1487_v3 = vld [vmem:[%s1944_s1 + $0x70] sm:$0xff]  ;;  %v1486_v5 = vld [vmem:[%s1944_s1 + $0x68] sm:$0xff] }
   0x3   :  { %251 = vmatpush.bf16.msra.mxu1 %v1488_v1  ;;  %1592 = vmatpush.bf16.msra.mxu3 %v1488_v1  ;;  %v1473_v6 = vld [vmem:[%s1944_s1 + $0x20] sm:$0xff]  ;;  %v1472_v8 = vld [vmem:[%s1944_s1 + $0x18] sm:$0xff]  ;;  %v1471_v10 = vld [vmem:[%s1944_s1 + $0x10] sm:$0xff] }
   0x4   :  { %v1485_v7 = vld [vmem:[%s1944_s1 + $0x60] sm:$0xff]  ;;  %v1484_v9 = vld [vmem:[%s1944_s1 + $0x58] sm:$0xff]  ;;  %v1483_v11 = vld [vmem:[%s1944_s1 + $0x50] sm:$0xff] }
   0x5   :  { %v1470_v12 = vld [vmem:[%s1944_s1 + $0x8] sm:$0xff]  ;;  %v1469_v14 = vld [vmem:[%s1944_s1] sm:$0xff]  ;;  %v1512_v16 = vld [vmem:[%s1944_s1 + $0x38] sm:$0xff] }
   0x6   :  { %115 = vmatpush.bf16.msra.mxu0 %v1475_v2  ;;  %1585 = vmatpush.bf16.msra.mxu2 %v1475_v2  ;;  %v1482_v13 = vld [vmem:[%s1944_s1 + $0x48] sm:$0xff]  ;;  %v1481_v15 = vld [vmem:[%s1944_s1 + $0x40] sm:$0xff]  ;;  %v1500_v17 = vld [vmem:[%s1944_s1 + $0xb8] sm:$0xff] }
   0x7   :  { %252 = vmatpush.bf16.msra.mxu1 %v1487_v3  ;;  %1593 = vmatpush.bf16.msra.mxu3 %v1487_v3  ;;  %v1465_v18 = vld [vmem:[%s1945_s0] sm:$0xff]  ;;  %v1467_v19 = vld [vmem:[%s1945_s0 + $0x10] sm:$0xff]  ;;  %v1524_v22 = vld [vmem:[%s1944_s1 + $0x78] sm:$0xff] }
   0x8   :  { %v1477_v20 = vld [vmem:[%s1945_s0 + $0x24] sm:$0xff]  ;;  %v1479_v21 = vld [vmem:[%s1945_s0 + $0x34] sm:$0xff]  ;;  %v1478_v40 = vld [vmem:[%s1945_s0 + $0x2c] sm:$0xff] }
   0x9   :  { %v1536_v23 = vld [vmem:[%s1944_s1 + $0xb8] sm:$0xff]  ;;  %v1511_v24 = vld [vmem:[%s1944_s1 + $0x30] sm:$0xff]  ;;  %v1510_v28 = vld [vmem:[%s1944_s1 + $0x28] sm:$0xff] }
   0xa   :  { %116 = vmatpush.bf16.msra.mxu0 %v1474_v4  ;;  %1586 = vmatpush.bf16.msra.mxu2 %v1474_v4  ;;  %v1499_v25 = vld [vmem:[%s1944_s1 + $0xb0] sm:$0xff]  ;;  %v1498_v29 = vld [vmem:[%s1944_s1 + $0xa8] sm:$0xff]  ;;  %v1509_v32 = vld [vmem:[%s1944_s1 + $0x20] sm:$0xff] }
   0xb   :  { %253 = vmatpush.bf16.msra.mxu1 %v1486_v5  ;;  %1594 = vmatpush.bf16.msra.mxu3 %v1486_v5  ;;  %v1523_v26 = vld [vmem:[%s1944_s1 + $0x70] sm:$0xff]  ;;  %v1522_v30 = vld [vmem:[%s1944_s1 + $0x68] sm:$0xff]  ;;  %v1497_v33 = vld [vmem:[%s1944_s1 + $0xa0] sm:$0xff] }
   0xc   :  { %v1535_v27 = vld [vmem:[%s1944_s1 + $0xb0] sm:$0xff]  ;;  %v1534_v31 = vld [vmem:[%s1944_s1 + $0xa8] sm:$0xff]  ;;  %v1521_v34 = vld [vmem:[%s1944_s1 + $0x60] sm:$0xff] }
   0xd   :  { %v1533_v35 = vld [vmem:[%s1944_s1 + $0xa0] sm:$0xff]  ;;  %v1508_v36 = vld [vmem:[%s1944_s1 + $0x18] sm:$0xff]  ;;  %v1466_v38 = vld [vmem:[%s1945_s0 + $0x8] sm:$0xff] }
   0xe   :  { %117 = vmatpush.bf16.msra.mxu0 %v1473_v6  ;;  %1587 = vmatpush.bf16.msra.mxu2 %v1473_v6  ;;  %v1496_v37 = vld [vmem:[%s1944_s1 + $0x98] sm:$0xff]  ;;  %v1507_v44 = vld [vmem:[%s1944_s1 + $0x10] sm:$0xff]  ;;  %v1506_v48 = vld [vmem:[%s1944_s1 + $0x8] sm:$0xff] }
   0xf   :  { %254 = vmatpush.bf16.msra.mxu1 %v1485_v7  ;;  %1595 = vmatpush.bf16.msra.mxu3 %v1485_v7  ;;  %v1468_v39 = vld [vmem:[%s1945_s0 + $0x18] sm:$0xff]  ;;  %v1495_v45 = vld [vmem:[%s1944_s1 + $0x90] sm:$0xff]  ;;  %v1494_v49 = vld [vmem:[%s1944_s1 + $0x88] sm:$0xff] }
  0x10   :  { %v1480_v41 = vld [vmem:[%s1945_s0 + $0x3c] sm:$0xff]  ;;  %v1519_v46 = vld [vmem:[%s1944_s1 + $0x50] sm:$0xff]  ;;  %v1518_v50 = vld [vmem:[%s1944_s1 + $0x48] sm:$0xff] }
  0x11   :  { %v1520_v42 = vld [vmem:[%s1944_s1 + $0x58] sm:$0xff]  ;;  %v1531_v47 = vld [vmem:[%s1944_s1 + $0x90] sm:$0xff]  ;;  %v1530_v51 = vld [vmem:[%s1944_s1 + $0x88] sm:$0xff] }
  0x12   :  { %118 = vmatpush.bf16.msra.mxu0 %v1472_v8  ;;  %1588 = vmatpush.bf16.msra.mxu2 %v1472_v8  ;;  %v1532_v43 = vld [vmem:[%s1944_s1 + $0x98] sm:$0xff]  ;;  %v1505_v52 = vld [vmem:[%s1944_s1] sm:$0xff]  ;;  %v1501_v57 = vld [vmem:[%s1945_s0 + $0x48] sm:$0xff] }
  0x13   :  { %255 = vmatpush.bf16.msra.mxu1 %v1484_v9  ;;  %1596 = vmatpush.bf16.msra.mxu3 %v1484_v9  ;;  %v1493_v53 = vld [vmem:[%s1944_s1 + $0x80] sm:$0xff]  ;;  %v1513_v58 = vld [vmem:[%s1945_s0 + $0x6c] sm:$0xff]  ;;  %v1514_v62 = vld [vmem:[%s1945_s0 + $0x74] sm:$0xff] }
  0x14   :  { %v1517_v54 = vld [vmem:[%s1944_s1 + $0x40] sm:$0xff]  ;;  %v1525_v59 = vld [vmem:[%s1945_s0 + $0x4c] sm:$0xff]  ;;  %v1526_v63 = vld [vmem:[%s1945_s0 + $0x54] sm:$0xff] }
  0x15   :  { %v1529_v55 = vld [vmem:[%s1944_s1 + $0x80] sm:$0xff]  ;;  %v1490_v60 = vld [vmem:[%s1945_s0 + $0xc] sm:$0xff]  ;;  %v1491_v0 = vld [vmem:[%s1945_s0 + $0x14] sm:$0xff] }
  0x16   :  { %119 = vmatpush.bf16.msra.mxu0 %v1471_v10  ;;  %1589 = vmatpush.bf16.msra.mxu2 %v1471_v10  ;;  %v1489_v56 = vld [vmem:[%s1945_s0 + $0x4] sm:$0xff]  ;;  %v1502_v61 = vld [vmem:[%s1945_s0 + $0x50] sm:$0xff]  ;;  %v1503_v1 = vld [vmem:[%s1945_s0 + $0x58] sm:$0xff] }
  0x17   :  { %256 = vmatpush.bf16.msra.mxu1 %v1483_v11  ;;  %1597 = vmatpush.bf16.msra.mxu3 %v1483_v11  ;;  %v1515_v2 = vld [vmem:[%s1945_s0 + $0x7c] sm:$0xff]  ;;  %v1516_v6 = vld [vmem:[%s1945_s0 + $0x84] sm:$0xff] }
  0x18   :  { %v1527_v3 = vld [vmem:[%s1945_s0 + $0x5c] sm:$0xff]  ;;  %v1528_v7 = vld [vmem:[%s1945_s0 + $0x64] sm:$0xff] }
  0x19   :  { %v1492_v4 = vld [vmem:[%s1945_s0 + $0x1c] sm:$0xff] }
  0x1a   :  { %120 = vmatpush.bf16.msra.mxu0 %v1470_v12  ;;  %1590 = vmatpush.bf16.msra.mxu2 %v1470_v12  ;;  %v1504_v5 = vld [vmem:[%s1945_s0 + $0x60] sm:$0xff] }
  0x1b   :  { %257 = vmatpush.bf16.msra.mxu1 %v1482_v13  ;;  %1598 = vmatpush.bf16.msra.mxu3 %v1482_v13 }
  0x1e   :  { %121 = vmatpush.bf16.msra.mxu0 %v1469_v14  ;;  %1591 = vmatpush.bf16.msra.mxu2 %v1469_v14 }
  0x1f   :  { %258 = vmatpush.bf16.msra.mxu1 %v1481_v15  ;;  %1599 = vmatpush.bf16.msra.mxu3 %v1481_v15 }
  0x21   :  { %122 = vmatmul.bf16.vlgmr.msra.gmra.mxu0 %v1465_v18  ;;  %132 = vmatmul.bf16.vlgmr.msra.gmra.mxu2 %v1467_v19 }
  0x22   :  { %408 = vmatpush.bf16.msrb.mxu2 %v1500_v17  ;;  %259 = vmatmul.bf16.vlgmr.msra.gmra.mxu1 %v1477_v20 }
  0x23   :  { %629 = vmatpush.bf16.msrb.mxu3 %v1512_v16  ;;  %765 = vmatpush.bf16.msrb.mxu0 %v1524_v22 }
  0x24   :  { %269 = vmatmul.bf16.vlgmr.msra.gmra.mxu3 %v1479_v21  ;;  %917 = vmatpush.bf16.msrb.mxu1 %v1536_v23 }
  0x26   :  { %409 = vmatpush.bf16.msrb.mxu2 %v1499_v25 }
  0x27   :  { %630 = vmatpush.bf16.msrb.mxu3 %v1511_v24  ;;  %766 = vmatpush.bf16.msrb.mxu0 %v1523_v26 }
  0x28   :  { %918 = vmatpush.bf16.msrb.mxu1 %v1535_v27 }
  0x2a   :  { %410 = vmatpush.bf16.msrb.mxu2 %v1498_v29 }
  0x2b   :  { %631 = vmatpush.bf16.msrb.mxu3 %v1510_v28  ;;  %767 = vmatpush.bf16.msrb.mxu0 %v1522_v30 }
  0x2c   :  { %919 = vmatpush.bf16.msrb.mxu1 %v1534_v31 }
  0x2e   :  { %411 = vmatpush.bf16.msrb.mxu2 %v1497_v33 }
  0x2f   :  { %632 = vmatpush.bf16.msrb.mxu3 %v1509_v32  ;;  %768 = vmatpush.bf16.msrb.mxu0 %v1521_v34 }
  0x30   :  { %920 = vmatpush.bf16.msrb.mxu1 %v1533_v35 }
  0x31   :  { %127 = vmatmul.bf16.gmra.mxu0 %v1466_v38  ;;  %137 = vmatmul.bf16.gmra.mxu2 %v1468_v39 }
  0x32   :  { %412 = vmatpush.bf16.msrb.mxu2 %v1496_v37  ;;  %264 = vmatmul.bf16.gmra.mxu1 %v1478_v40 }
  0x33   :  { %633 = vmatpush.bf16.msrb.mxu3 %v1508_v36  ;;  %769 = vmatpush.bf16.msrb.mxu0 %v1520_v42 }
  0x34   :  { %274 = vmatmul.bf16.gmra.mxu3 %v1480_v41  ;;  %921 = vmatpush.bf16.msrb.mxu1 %v1532_v43 }
  0x36   :  { %413 = vmatpush.bf16.msrb.mxu2 %v1495_v45 }
  0x37   :  { %634 = vmatpush.bf16.msrb.mxu3 %v1507_v44  ;;  %770 = vmatpush.bf16.msrb.mxu0 %v1519_v46 }
  0x38   :  { %922 = vmatpush.bf16.msrb.mxu1 %v1531_v47 }
  0x3a   :  { %414 = vmatpush.bf16.msrb.mxu2 %v1494_v49 }
  0x3b   :  { %635 = vmatpush.bf16.msrb.mxu3 %v1506_v48  ;;  %771 = vmatpush.bf16.msrb.mxu0 %v1518_v50 }
  0x3c   :  { %923 = vmatpush.bf16.msrb.mxu1 %v1530_v51 }
  0x3e   :  { %415 = vmatpush.bf16.msrb.mxu2 %v1493_v53 }
  0x3f   :  { %636 = vmatpush.bf16.msrb.mxu3 %v1505_v52  ;;  %772 = vmatpush.bf16.msrb.mxu0 %v1517_v54 }
  0x40   :  { %924 = vmatpush.bf16.msrb.mxu1 %v1529_v55 }
  0x41   :  { %416 = vmatmul.bf16.vlgmr.msrb.gmra.mxu2 %v1489_v56 }
  0x42   :  { %773 = vmatmul.bf16.vlgmr.msrb.gmra.mxu0 %v1513_v58 }
  0x43   :  { %925 = vmatmul.bf16.vlgmr.msrb.gmra.mxu1 %v1525_v59 }
  0x44   :  { %637 = vmatmul.bf16.vlgmr.msrb.gmra.mxu3 %v1501_v57 }
  0x51   :  { %421 = vmatmul.bf16.gmra.mxu2 %v1490_v60 }
  0x52   :  { %778 = vmatmul.bf16.gmra.mxu0 %v1514_v62 }
  0x53   :  { %930 = vmatmul.bf16.gmra.mxu1 %v1526_v63 }
  0x54   :  { %642 = vmatmul.bf16.gmra.mxu3 %v1502_v61 }
  0x61   :  { %426 = vmatmul.bf16.gmra.mxu2 %v1491_v0 }
  0x62   :  { %783 = vmatmul.bf16.gmra.mxu0 %v1515_v2 }
  0x63   :  { %935 = vmatmul.bf16.gmra.mxu1 %v1527_v3 }
  0x64   :  { %647 = vmatmul.bf16.gmra.mxu3 %v1503_v1 }
  0x71   :  { %431 = vmatmul.bf16.gmra.mxu2 %v1492_v4 }
  0x72   :  { %788 = vmatmul.bf16.gmra.mxu0 %v1516_v6 }
  0x73   :  { %940 = vmatmul.bf16.gmra.mxu1 %v1528_v7 }
  0x74   :  { %652 = vmatmul.bf16.gmra.mxu3 %v1504_v5 }
  0x9e   :  { %v123_v8 = vpop.f32.mrf.mxu0 }
  0x9f   :  { %v260_v9 = vpop.f32.mrf.mxu1 }
  0xa0   :  { %v288_v32 = vadd.f32 %v260_v9, %v123_v8 }
  0xa4   :  { %v133_v10 = vpop.f32.mrf.mxu2 }
  0xa6   :  { %v125_v13 = vpop.f32.mrf.mxu0 }
  0xa7   :  { %v270_v11 = vpop.f32.mrf.mxu3  ;;  %v262_v14 = vpop.f32.mrf.mxu1 }
  0xa8   :  { %v1836_v12 = vadd.f32 %v270_v11, %v133_v10  ;;  %v289_v33 = vadd.f32 %v262_v14, %v125_v13 }
  0xac   :  { %v135_v15 = vpop.f32.mrf.mxu2 }
  0xae   :  { %v128_v17 = vpop.f32.mrf.mxu0 }
  0xaf   :  { %v272_v16 = vpop.f32.mrf.mxu3  ;;  %v265_v18 = vpop.f32.mrf.mxu1 }
  0xb0   :  { %v290_v50 = vadd.f32 %v265_v18, %v128_v17  ;;  %v293_v3 = vadd.f32 %v272_v16, %v135_v15 }
  0xb4   :  { %v138_v19 = vpop.f32.mrf.mxu2 }
  0xb6   :  { %v130_v22 = vpop.f32.mrf.mxu0 }
  0xb7   :  { %v275_v20 = vpop.f32.mrf.mxu3  ;;  %v267_v23 = vpop.f32.mrf.mxu1 }
  0xb8   :  { %v1838_v21 = vadd.f32 %v275_v20, %v138_v19  ;;  %v291_v51 = vadd.f32 %v267_v23, %v130_v22 }
  0xbc   :  { %v1840_v24 = vpop.f32.mrf.mxu2 }
  0xbf   :  { %v1842_v25 = vpop.f32.mrf.mxu3  ;;  %v774_v26 = vpop.f32.mrf.mxu0 }
  0xc0   :  { %v926_v27 = vpop.f32.mrf.mxu1 }
  0xc4   :  { %v417_v28 = vpop.f32.mrf.mxu2 }
  0xc5   :  { %v1844_v36 = vadd.f32 %v417_v28, %v288_v32 }
  0xc7   :  { %v638_v29 = vpop.f32.mrf.mxu3  ;;  %v776_v30 = vpop.f32.mrf.mxu0 }
  0xc8   :  { %v928_v31 = vpop.f32.mrf.mxu1  ;;  %v802_v34 = vadd.f32 %v774_v26, %v638_v29 }
  0xca   :  { %v1850_v42 = vadd.f32 %v926_v27, %v802_v34 }
  0xcc   :  { %v419_v35 = vpop.f32.mrf.mxu2 }
  0xcd   :  { %v1846_v37 = vadd.f32 %v419_v35, %v289_v33  ;;  %v295_v33 = vadd.f32 %v1842_v25, %v1840_v24 }
  0xcf   :  { %v640_v38 = vpop.f32.mrf.mxu3  ;;  %v1540_v40 = vpack.c.bf16 %v1846_v37, %v1844_v36  ;;  %v779_v41 = vpop.f32.mrf.mxu0  ;;  %v485_v7 = vadd.f32 %v1846_v37, %v1844_v36 }
  0xd0   :  { %v803_v39 = vadd.f32 %v776_v30, %v640_v38  ;;  %v931_v44 = vpop.f32.mrf.mxu1 }
  0xd1   :  { %1541 = vst [vmem:[%s1946_s2] sm:$0xff] %v1540_v40  }
  0xd2   :  { %v1852_v43 = vadd.f32 %v928_v31, %v803_v39 }
  0xd4   :  { %v1560_v45 = vpack.c.bf16 %v1852_v43, %v1850_v42  ;;  %v422_v46 = vpop.f32.mrf.mxu2  ;;  %v995_v28 = vadd.f32 %v1852_v43, %v1850_v42 }
  0xd5   :  { %v1862_v54 = vadd.f32 %v422_v46, %v290_v50 }
  0xd6   :  { %1580 = vst [vmem:[%s1946_s2 + $0x20] sm:$0xff] %v1560_v45  }
  0xd7   :  { %v643_v47 = vpop.f32.mrf.mxu3  ;;  %v781_v48 = vpop.f32.mrf.mxu0  ;;  %v486_v13 = vadd.f32 %v485_v7, %v1862_v54 }
  0xd8   :  { %v933_v49 = vpop.f32.mrf.mxu1  ;;  %v804_v52 = vadd.f32 %v779_v41, %v643_v47 }
  0xda   :  { %v1868_v60 = vadd.f32 %v931_v44, %v804_v52 }
  0xdc   :  { %v424_v53 = vpop.f32.mrf.mxu2  ;;  %v996_v30 = vadd.f32 %v995_v28, %v1868_v60 }
  0xdd   :  { %v1864_v55 = vadd.f32 %v424_v53, %v291_v51 }
  0xdf   :  { %v645_v56 = vpop.f32.mrf.mxu3  ;;  %v1545_v58 = vpack.c.bf16 %v1864_v55, %v1862_v54  ;;  %v784_v59 = vpop.f32.mrf.mxu0  ;;  %v487_v15 = vadd.f32 %v486_v13, %v1864_v55 }
  0xe0   :  { %v805_v57 = vadd.f32 %v781_v48, %v645_v56  ;;  %v936_v62 = vpop.f32.mrf.mxu1 }
  0xe1   :  { %1577 = vst [vmem:[%s1946_s2 + $0x8] sm:$0xff] %v1545_v58  }
  0xe2   :  { %v1870_v61 = vadd.f32 %v933_v49, %v805_v57 }
  0xe4   :  { %v1565_v63 = vpack.c.bf16 %v1870_v61, %v1868_v60  ;;  %v427_v0 = vpop.f32.mrf.mxu2  ;;  %v997_v32 = vadd.f32 %v996_v30, %v1870_v61 }
  0xe5   :  { %v449_v8 = vadd.f32 %v427_v0, %v1836_v12 }
  0xe6   :  { %1581 = vst [vmem:[%s1946_s2 + $0x28] sm:$0xff] %v1565_v63  }
  0xe7   :  { %v648_v1 = vpop.f32.mrf.mxu3  ;;  %v786_v2 = vpop.f32.mrf.mxu0  ;;  %v488_v16 = vadd.f32 %v487_v15, %v449_v8 }
  0xe8   :  { %v938_v4 = vpop.f32.mrf.mxu1  ;;  %v806_v5 = vadd.f32 %v784_v59, %v648_v1 }
  0xea   :  { %v1887_v17 = vadd.f32 %v936_v62, %v806_v5 }
  0xec   :  { %v429_v6 = vpop.f32.mrf.mxu2  ;;  %v998_v34 = vadd.f32 %v997_v32, %v1887_v17 }
  0xed   :  { %v1883_v9 = vadd.f32 %v429_v6, %v293_v3 }
  0xef   :  { %v650_v10 = vpop.f32.mrf.mxu3  ;;  %v1550_v14 = vpack.c.bf16 %v1883_v9, %v449_v8  ;;  %v789_v19 = vpop.f32.mrf.mxu0  ;;  %v489_v22 = vadd.f32 %v488_v16, %v1883_v9 }
  0xf0   :  { %v807_v11 = vadd.f32 %v786_v2, %v650_v10  ;;  %v941_v23 = vpop.f32.mrf.mxu1 }
  0xf1   :  { %1578 = vst [vmem:[%s1946_s2 + $0x10] sm:$0xff] %v1550_v14  }
  0xf2   :  { %v1889_v18 = vadd.f32 %v938_v4, %v807_v11 }
  0xf4   :  { %v1570_v12 = vpack.c.bf16 %v1889_v18, %v1887_v17  ;;  %v432_v20 = vpop.f32.mrf.mxu2  ;;  %v999_v41 = vadd.f32 %v998_v34, %v1889_v18 }
  0xf5   :  { %v451_v26 = vadd.f32 %v432_v20, %v1838_v21 }
  0xf6   :  { %1582 = vst [vmem:[%s1946_s2 + $0x30] sm:$0xff] %v1570_v12  }
  0xf7   :  { %v653_v27 = vpop.f32.mrf.mxu3  ;;  %v490_v29 = vadd.f32 %v489_v22, %v451_v26  ;;  %v791_v39 = vpop.f32.mrf.mxu0 }
  0xf8   :  { %v808_v31 = vadd.f32 %v789_v19, %v653_v27  ;;  %v943_v45 = vpop.f32.mrf.mxu1 }
  0xfa   :  { %v1909_v35 = vadd.f32 %v941_v23, %v808_v31 }
  0xfc   :  { %v434_v38 = vpop.f32.mrf.mxu2  ;;  %v1000_v48 = vadd.f32 %v999_v41, %v1909_v35 }
  0xfd   :  { %v452_v21 = vadd.f32 %v434_v38, %v295_v33 }
  0xff   :  { %v655_v40 = vpop.f32.mrf.mxu3  ;;  %v1555_v46 = vpack.c.bf16 %v452_v21, %v451_v26  ;;  %v491_v47 = vadd.f32 %v490_v29, %v452_v21 }
 0x100   :  { %v809_v44 = vadd.f32 %v791_v39, %v655_v40 }
 0x101   :  { %1579 = vst [vmem:[%s1946_s2 + $0x18] sm:$0xff] %v1555_v46   ;;  %v492_v24 = vrot.slane %v491_v47, 4 }
 0x102   :  { %v961_v49 = vadd.f32 %v943_v45, %v809_v44 }
 0x103   :  { %v493_v51 = vadd.f32 %v492_v24, %v491_v47 }
 0x104   :  { %v1575_v25 = vpack.c.bf16 %v961_v49, %v1909_v35  ;;  %v1001_v50 = vadd.f32 %v1000_v48, %v961_v49 }
 0x105   :  { %v494_v53 = vrot.slane %v493_v51, 2 }
 0x106   :  { %1583 = vst [vmem:[%s1946_s2 + $0x38] sm:$0xff] %v1575_v25   ;;  %v1002_v52 = vrot.slane %v1001_v50, 4 }
 0x107   :  { %v495_v57 = vadd.f32 %v494_v53, %v493_v51 }
 0x108   :  { %v1003_v56 = vadd.f32 %v1002_v52, %v1001_v50 }
 0x109   :  { %v496_v59 = vrot.slane %v495_v57, 1 }
 0x10a   :  { %v1004_v58 = vrot.slane %v1003_v56, 2 }
 0x10b   :  { %v497_v63 = vadd.f32 %v496_v59, %v495_v57 }
 0x10c   :  { %v1005_v62 = vadd.f32 %v1004_v58, %v1003_v56 }
 0x10d   :  { %v498_v1 = vmul.f32 0.015625, %v497_v63  ;;  %507 = vst [vmem:[%s1947_s3] sm:$0x1] %v497_v63 }
 0x10e   :  { %v1006_v0 = vrot.slane %v1005_v62, 1 }
 0x10f   :  { %v499_v3 = vsub.f32 %v1844_v36, %v498_v1  ;;  %v500_v4 = vsub.f32 %v1846_v37, %v498_v1  ;;  %v501_v5 = vsub.f32 %v1862_v54, %v498_v1  ;;  %v502_v6 = vsub.f32 %v1864_v55, %v498_v1 }
 0x110   :  { %v1007_v2 = vadd.f32 %v1006_v0, %v1005_v62  ;;  %v503_v7 = vsub.f32 %v449_v8, %v498_v1  ;;  %v505_v10 = vsub.f32 %v451_v26, %v498_v1  ;;  %v504_v16 = vsub.f32 %v1883_v9, %v498_v1 }
 0x111   :  { %v508_v11 = vmul.f32 %v499_v3, %v499_v3  ;;  %v509_v13 = vmul.f32 %v500_v4, %v500_v4  ;;  %v510_v14 = vmul.f32 %v501_v5, %v501_v5  ;;  %v511_v36 = vmul.f32 %v502_v6, %v502_v6 }
 0x112   :  { %1017 = vst [vmem:[%s1947_s3 + $0x2] sm:$0x1] %v1007_v2  ;;  %v1008_v12 = vmul.f32 0.015625, %v1007_v2  ;;  %v512_v8 = vmul.f32 %v503_v7, %v503_v7  ;;  %v506_v27 = vsub.f32 %v452_v21, %v498_v1  ;;  %v513_v28 = vmul.f32 %v504_v16, %v504_v16 }
 0x113   :  { %v516_v15 = vadd.f32 %v509_v13, %v508_v11  ;;  %v514_v32 = vmul.f32 %v505_v10, %v505_v10 }
 0x114   :  { %v1009_v37 = vsub.f32 %v1850_v42, %v1008_v12  ;;  %v1010_v54 = vsub.f32 %v1852_v43, %v1008_v12  ;;  %v1011_v55 = vsub.f32 %v1868_v60, %v1008_v12  ;;  %v1012_v22 = vsub.f32 %v1870_v61, %v1008_v12 }
 0x115   :  { %v517_v19 = vadd.f32 %v516_v15, %v510_v14  ;;  %v1013_v30 = vsub.f32 %v1887_v17, %v1008_v12  ;;  %v1014_v42 = vsub.f32 %v1889_v18, %v1008_v12  ;;  %v515_v60 = vmul.f32 %v506_v27, %v506_v27 }
 0x116   :  { %v1018_v23 = vmul.f32 %v1009_v37, %v1009_v37  ;;  %v1019_v26 = vmul.f32 %v1010_v54, %v1010_v54  ;;  %v1020_v9 = vmul.f32 %v1011_v55, %v1011_v55  ;;  %v1021_v43 = vmul.f32 %v1012_v22, %v1012_v22 }
 0x117   :  { %v518_v20 = vadd.f32 %v517_v19, %v511_v36  ;;  %v1015_v39 = vsub.f32 %v1909_v35, %v1008_v12  ;;  %v1022_v61 = vmul.f32 %v1013_v30, %v1013_v30  ;;  %v1016_v21 = vsub.f32 %v961_v49, %v1008_v12 }
 0x118   :  { %v1026_v31 = vadd.f32 %v1019_v26, %v1018_v23  ;;  %v1023_v44 = vmul.f32 %v1014_v42, %v1014_v42 }
 0x119   :  { %v519_v29 = vadd.f32 %v518_v20, %v512_v8  ;;  %v1024_v17 = vmul.f32 %v1015_v39, %v1015_v39  ;;  %v1025_v24 = vmul.f32 %v1016_v21, %v1016_v21 }
 0x11a   :  { %v1027_v34 = vadd.f32 %v1026_v31, %v1020_v9 }
 0x11b   :  { %v520_v33 = vadd.f32 %v519_v29, %v513_v28 }
 0x11c   :  { %v1028_v40 = vadd.f32 %v1027_v34, %v1021_v43 }
 0x11d   :  { %v521_v38 = vadd.f32 %v520_v33, %v514_v32 }
 0x11e   :  { %v1029_v45 = vadd.f32 %v1028_v40, %v1022_v61 }
 0x11f   :  { %v522_v41 = vadd.f32 %v521_v38, %v515_v60 }
 0x120   :  { %v1030_v47 = vadd.f32 %v1029_v45, %v1023_v44 }
 0x121   :  { %v523_v46 = vrot.slane %v522_v41, 4 }
 0x122   :  { %v1031_v25 = vadd.f32 %v1030_v47, %v1024_v17 }
 0x123   :  { %v524_v48 = vadd.f32 %v523_v46, %v522_v41 }
 0x124   :  { %v1032_v18 = vadd.f32 %v1031_v25, %v1025_v24 }
 0x125   :  { %v525_v50 = vrot.slane %v524_v48, 2 }
 0x126   :  { %v1033_v52 = vrot.slane %v1032_v18, 4 }
 0x127   :  { %v526_v51 = vadd.f32 %v525_v50, %v524_v48 }
 0x128   :  { %v1034_v56 = vadd.f32 %v1033_v52, %v1032_v18 }
 0x129   :  { %v527_v53 = vrot.slane %v526_v51, 1 }
 0x12a   :  { %v1035_v35 = vrot.slane %v1034_v56, 2 }
 0x12b   :  { %v528_v57 = vadd.f32 %v527_v53, %v526_v51 }
 0x12c   :  { %v1036_v49 = vadd.f32 %v1035_v35, %v1034_v56 }
 0x12d   :  { %529 = vst [vmem:[%s1947_s3 + $0x1] sm:$0x1] %v528_v57 }
 0x12e   :  { %v1037_v58 = vrot.slane %v1036_v49, 1 }
 0x130   :  { %v1038_v59 = vadd.f32 %v1037_v58, %v1036_v49 }
 0x132   :  { %1039 = vst [vmem:[%s1947_s3 + $0x3] sm:$0x1] %v1038_v59 }

// kernel: basic_transform.4
= control target key start
LH: loop header
LB: loop body
LE: loop exit
PB: predicated region body
PF: predicated region fallthrough
CT: control target
= control target key end

     0   :  { %s1947_s1 = inlined_call_operand.vmem [shape: bf16[3,128,128], index: 1, kind: input, shape index: {}]   ;;  %s1948_s0 = inlined_call_operand.vmem [shape: bf16[2,1,80,128], index: 0, kind: input, shape index: {}]   ;;  %s1949_s2 = inlined_call_operand.vmem [shape: bf16[2,64,128], index: 2, kind: output, shape index: {0}]   ;;  %s1950_s3 = inlined_call_operand.vmem [shape: f32[1,1,4,128], index: 3, kind: output, shape index: {1}]  }
   0x1   :  { %v1479_v0 = vld [vmem:[%s1947_s1 + $0x38] sm:$0xff]  ;;  %v1478_v2 = vld [vmem:[%s1947_s1 + $0x30] sm:$0xff]  ;;  %v1477_v4 = vld [vmem:[%s1947_s1 + $0x28] sm:$0xff] }
   0x2   :  { %v1491_v1 = vld [vmem:[%s1947_s1 + $0x78] sm:$0xff]  ;;  %114 = vmatpush.bf16.msra.mxu0 %v1479_v0  ;;  %1587 = vmatpush.bf16.msra.mxu2 %v1479_v0  ;;  %v1490_v3 = vld [vmem:[%s1947_s1 + $0x70] sm:$0xff]  ;;  %v1489_v5 = vld [vmem:[%s1947_s1 + $0x68] sm:$0xff] }
   0x3   :  { %255 = vmatpush.bf16.msra.mxu1 %v1491_v1  ;;  %1595 = vmatpush.bf16.msra.mxu3 %v1491_v1  ;;  %v1476_v6 = vld [vmem:[%s1947_s1 + $0x20] sm:$0xff]  ;;  %v1475_v8 = vld [vmem:[%s1947_s1 + $0x18] sm:$0xff]  ;;  %v1474_v10 = vld [vmem:[%s1947_s1 + $0x10] sm:$0xff] }
   0x4   :  { %v1488_v7 = vld [vmem:[%s1947_s1 + $0x60] sm:$0xff]  ;;  %v1487_v9 = vld [vmem:[%s1947_s1 + $0x58] sm:$0xff]  ;;  %v1486_v11 = vld [vmem:[%s1947_s1 + $0x50] sm:$0xff] }
   0x5   :  { %v1473_v12 = vld [vmem:[%s1947_s1 + $0x8] sm:$0xff]  ;;  %v1472_v14 = vld [vmem:[%s1947_s1] sm:$0xff]  ;;  %v1515_v16 = vld [vmem:[%s1947_s1 + $0x38] sm:$0xff] }
   0x6   :  { %115 = vmatpush.bf16.msra.mxu0 %v1478_v2  ;;  %1588 = vmatpush.bf16.msra.mxu2 %v1478_v2  ;;  %v1485_v13 = vld [vmem:[%s1947_s1 + $0x48] sm:$0xff]  ;;  %v1484_v15 = vld [vmem:[%s1947_s1 + $0x40] sm:$0xff]  ;;  %v1503_v17 = vld [vmem:[%s1947_s1 + $0xb8] sm:$0xff] }
   0x7   :  { %256 = vmatpush.bf16.msra.mxu1 %v1490_v3  ;;  %1596 = vmatpush.bf16.msra.mxu3 %v1490_v3  ;;  %v1468_v18 = vld [vmem:[%s1948_s0] sm:$0xff]  ;;  %v1470_v19 = vld [vmem:[%s1948_s0 + $0x10] sm:$0xff]  ;;  %v1527_v22 = vld [vmem:[%s1947_s1 + $0x78] sm:$0xff] }
   0x8   :  { %v1480_v20 = vld [vmem:[%s1948_s0 + $0x4] sm:$0xff]  ;;  %v1482_v21 = vld [vmem:[%s1948_s0 + $0x14] sm:$0xff]  ;;  %v1481_v40 = vld [vmem:[%s1948_s0 + $0xc] sm:$0xff] }
   0x9   :  { %v1539_v23 = vld [vmem:[%s1947_s1 + $0xb8] sm:$0xff]  ;;  %v1514_v24 = vld [vmem:[%s1947_s1 + $0x30] sm:$0xff]  ;;  %v1513_v28 = vld [vmem:[%s1947_s1 + $0x28] sm:$0xff] }
   0xa   :  { %116 = vmatpush.bf16.msra.mxu0 %v1477_v4  ;;  %1589 = vmatpush.bf16.msra.mxu2 %v1477_v4  ;;  %v1502_v25 = vld [vmem:[%s1947_s1 + $0xb0] sm:$0xff]  ;;  %v1501_v29 = vld [vmem:[%s1947_s1 + $0xa8] sm:$0xff]  ;;  %v1512_v32 = vld [vmem:[%s1947_s1 + $0x20] sm:$0xff] }
   0xb   :  { %257 = vmatpush.bf16.msra.mxu1 %v1489_v5  ;;  %1597 = vmatpush.bf16.msra.mxu3 %v1489_v5  ;;  %v1526_v26 = vld [vmem:[%s1947_s1 + $0x70] sm:$0xff]  ;;  %v1525_v30 = vld [vmem:[%s1947_s1 + $0x68] sm:$0xff]  ;;  %v1500_v33 = vld [vmem:[%s1947_s1 + $0xa0] sm:$0xff] }
   0xc   :  { %v1538_v27 = vld [vmem:[%s1947_s1 + $0xb0] sm:$0xff]  ;;  %v1537_v31 = vld [vmem:[%s1947_s1 + $0xa8] sm:$0xff]  ;;  %v1524_v34 = vld [vmem:[%s1947_s1 + $0x60] sm:$0xff] }
   0xd   :  { %v1536_v35 = vld [vmem:[%s1947_s1 + $0xa0] sm:$0xff]  ;;  %v1511_v36 = vld [vmem:[%s1947_s1 + $0x18] sm:$0xff]  ;;  %v1469_v38 = vld [vmem:[%s1948_s0 + $0x8] sm:$0xff] }
   0xe   :  { %117 = vmatpush.bf16.msra.mxu0 %v1476_v6  ;;  %1590 = vmatpush.bf16.msra.mxu2 %v1476_v6  ;;  %v1499_v37 = vld [vmem:[%s1947_s1 + $0x98] sm:$0xff]  ;;  %v1510_v44 = vld [vmem:[%s1947_s1 + $0x10] sm:$0xff]  ;;  %v1509_v48 = vld [vmem:[%s1947_s1 + $0x8] sm:$0xff] }
   0xf   :  { %258 = vmatpush.bf16.msra.mxu1 %v1488_v7  ;;  %1598 = vmatpush.bf16.msra.mxu3 %v1488_v7  ;;  %v1471_v39 = vld [vmem:[%s1948_s0 + $0x18] sm:$0xff]  ;;  %v1498_v45 = vld [vmem:[%s1947_s1 + $0x90] sm:$0xff]  ;;  %v1497_v49 = vld [vmem:[%s1947_s1 + $0x88] sm:$0xff] }
  0x10   :  { %v1483_v41 = vld [vmem:[%s1948_s0 + $0x1c] sm:$0xff]  ;;  %v1522_v46 = vld [vmem:[%s1947_s1 + $0x50] sm:$0xff]  ;;  %v1521_v50 = vld [vmem:[%s1947_s1 + $0x48] sm:$0xff] }
  0x11   :  { %v1523_v42 = vld [vmem:[%s1947_s1 + $0x58] sm:$0xff]  ;;  %v1534_v47 = vld [vmem:[%s1947_s1 + $0x90] sm:$0xff]  ;;  %v1533_v51 = vld [vmem:[%s1947_s1 + $0x88] sm:$0xff] }
  0x12   :  { %118 = vmatpush.bf16.msra.mxu0 %v1475_v8  ;;  %1591 = vmatpush.bf16.msra.mxu2 %v1475_v8  ;;  %v1535_v43 = vld [vmem:[%s1947_s1 + $0x98] sm:$0xff]  ;;  %v1508_v52 = vld [vmem:[%s1947_s1] sm:$0xff]  ;;  %v1492_v56 = vld [vmem:[%s1948_s0 + $0x8] sm:$0xff] }
  0x13   :  { %259 = vmatpush.bf16.msra.mxu1 %v1487_v9  ;;  %1599 = vmatpush.bf16.msra.mxu3 %v1487_v9  ;;  %v1496_v53 = vld [vmem:[%s1947_s1 + $0x80] sm:$0xff]  ;;  %v1504_v57 = vld [vmem:[%s1948_s0 + $0x28] sm:$0xff]  ;;  %v1528_v59 = vld [vmem:[%s1948_s0 + $0x30] sm:$0xff] }
  0x14   :  { %v1520_v54 = vld [vmem:[%s1947_s1 + $0x40] sm:$0xff]  ;;  %v1516_v58 = vld [vmem:[%s1948_s0 + $0x2c] sm:$0xff]  ;;  %v1517_v62 = vld [vmem:[%s1948_s0 + $0x34] sm:$0xff] }
  0x15   :  { %v1532_v55 = vld [vmem:[%s1947_s1 + $0x80] sm:$0xff]  ;;  %v1493_v60 = vld [vmem:[%s1948_s0 + $0x10] sm:$0xff]  ;;  %v1529_v63 = vld [vmem:[%s1948_s0 + $0x38] sm:$0xff] }
  0x16   :  { %119 = vmatpush.bf16.msra.mxu0 %v1474_v10  ;;  %1592 = vmatpush.bf16.msra.mxu2 %v1474_v10  ;;  %v1505_v61 = vld [vmem:[%s1948_s0 + $0x30] sm:$0xff]  ;;  %v1494_v0 = vld [vmem:[%s1948_s0 + $0x18] sm:$0xff]  ;;  %v1530_v3 = vld [vmem:[%s1948_s0 + $0x40] sm:$0xff] }
  0x17   :  { %260 = vmatpush.bf16.msra.mxu1 %v1486_v11  ;;  %1600 = vmatpush.bf16.msra.mxu3 %v1486_v11  ;;  %v1506_v1 = vld [vmem:[%s1948_s0 + $0x38] sm:$0xff]  ;;  %v1495_v4 = vld [vmem:[%s1948_s0 + $0x20] sm:$0xff]  ;;  %v1531_v7 = vld [vmem:[%s1948_s0 + $0x48] sm:$0xff] }
  0x18   :  { %v1518_v2 = vld [vmem:[%s1948_s0 + $0x3c] sm:$0xff]  ;;  %v1519_v6 = vld [vmem:[%s1948_s0 + $0x44] sm:$0xff] }
  0x19   :  { %v1507_v5 = vld [vmem:[%s1948_s0 + $0x40] sm:$0xff] }
  0x1a   :  { %120 = vmatpush.bf16.msra.mxu0 %v1473_v12  ;;  %1593 = vmatpush.bf16.msra.mxu2 %v1473_v12 }
  0x1b   :  { %261 = vmatpush.bf16.msra.mxu1 %v1485_v13  ;;  %1601 = vmatpush.bf16.msra.mxu3 %v1485_v13 }
  0x1e   :  { %121 = vmatpush.bf16.msra.mxu0 %v1472_v14  ;;  %1594 = vmatpush.bf16.msra.mxu2 %v1472_v14 }
  0x1f   :  { %262 = vmatpush.bf16.msra.mxu1 %v1484_v15  ;;  %1602 = vmatpush.bf16.msra.mxu3 %v1484_v15 }
  0x21   :  { %122 = vmatmul.bf16.vlgmr.msra.gmra.mxu0 %v1468_v18  ;;  %132 = vmatmul.bf16.vlgmr.msra.gmra.mxu2 %v1470_v19 }
  0x22   :  { %411 = vmatpush.bf16.msrb.mxu2 %v1503_v17  ;;  %263 = vmatmul.bf16.vlgmr.msra.gmra.mxu1 %v1480_v20 }
  0x23   :  { %632 = vmatpush.bf16.msrb.mxu3 %v1515_v16  ;;  %768 = vmatpush.bf16.msrb.mxu0 %v1527_v22 }
  0x24   :  { %273 = vmatmul.bf16.vlgmr.msra.gmra.mxu3 %v1482_v21  ;;  %920 = vmatpush.bf16.msrb.mxu1 %v1539_v23 }
  0x26   :  { %412 = vmatpush.bf16.msrb.mxu2 %v1502_v25 }
  0x27   :  { %633 = vmatpush.bf16.msrb.mxu3 %v1514_v24  ;;  %769 = vmatpush.bf16.msrb.mxu0 %v1526_v26 }
  0x28   :  { %921 = vmatpush.bf16.msrb.mxu1 %v1538_v27 }
  0x2a   :  { %413 = vmatpush.bf16.msrb.mxu2 %v1501_v29 }
  0x2b   :  { %634 = vmatpush.bf16.msrb.mxu3 %v1513_v28  ;;  %770 = vmatpush.bf16.msrb.mxu0 %v1525_v30 }
  0x2c   :  { %922 = vmatpush.bf16.msrb.mxu1 %v1537_v31 }
  0x2e   :  { %414 = vmatpush.bf16.msrb.mxu2 %v1500_v33 }
  0x2f   :  { %635 = vmatpush.bf16.msrb.mxu3 %v1512_v32  ;;  %771 = vmatpush.bf16.msrb.mxu0 %v1524_v34 }
  0x30   :  { %923 = vmatpush.bf16.msrb.mxu1 %v1536_v35 }
  0x31   :  { %127 = vmatmul.bf16.gmra.mxu0 %v1469_v38  ;;  %137 = vmatmul.bf16.gmra.mxu2 %v1471_v39 }
  0x32   :  { %415 = vmatpush.bf16.msrb.mxu2 %v1499_v37  ;;  %268 = vmatmul.bf16.gmra.mxu1 %v1481_v40 }
  0x33   :  { %636 = vmatpush.bf16.msrb.mxu3 %v1511_v36  ;;  %772 = vmatpush.bf16.msrb.mxu0 %v1523_v42 }
  0x34   :  { %278 = vmatmul.bf16.gmra.mxu3 %v1483_v41  ;;  %924 = vmatpush.bf16.msrb.mxu1 %v1535_v43 }
  0x36   :  { %416 = vmatpush.bf16.msrb.mxu2 %v1498_v45 }
  0x37   :  { %637 = vmatpush.bf16.msrb.mxu3 %v1510_v44  ;;  %773 = vmatpush.bf16.msrb.mxu0 %v1522_v46 }
  0x38   :  { %925 = vmatpush.bf16.msrb.mxu1 %v1534_v47 }
  0x3a   :  { %417 = vmatpush.bf16.msrb.mxu2 %v1497_v49 }
  0x3b   :  { %638 = vmatpush.bf16.msrb.mxu3 %v1509_v48  ;;  %774 = vmatpush.bf16.msrb.mxu0 %v1521_v50 }
  0x3c   :  { %926 = vmatpush.bf16.msrb.mxu1 %v1533_v51 }
  0x3e   :  { %418 = vmatpush.bf16.msrb.mxu2 %v1496_v53 }
  0x3f   :  { %639 = vmatpush.bf16.msrb.mxu3 %v1508_v52  ;;  %775 = vmatpush.bf16.msrb.mxu0 %v1520_v54 }
  0x40   :  { %927 = vmatpush.bf16.msrb.mxu1 %v1532_v55 }
  0x41   :  { %419 = vmatmul.bf16.vlgmr.msrb.gmra.mxu2 %v1492_v56 }
  0x42   :  { %776 = vmatmul.bf16.vlgmr.msrb.gmra.mxu0 %v1516_v58 }
  0x43   :  { %928 = vmatmul.bf16.vlgmr.msrb.gmra.mxu1 %v1528_v59 }
  0x44   :  { %640 = vmatmul.bf16.vlgmr.msrb.gmra.mxu3 %v1504_v57 }
  0x51   :  { %424 = vmatmul.bf16.gmra.mxu2 %v1493_v60 }
  0x52   :  { %781 = vmatmul.bf16.gmra.mxu0 %v1517_v62 }
  0x53   :  { %933 = vmatmul.bf16.gmra.mxu1 %v1529_v63 }
  0x54   :  { %645 = vmatmul.bf16.gmra.mxu3 %v1505_v61 }
  0x61   :  { %429 = vmatmul.bf16.gmra.mxu2 %v1494_v0 }
  0x62   :  { %786 = vmatmul.bf16.gmra.mxu0 %v1518_v2 }
  0x63   :  { %938 = vmatmul.bf16.gmra.mxu1 %v1530_v3 }
  0x64   :  { %650 = vmatmul.bf16.gmra.mxu3 %v1506_v1 }
  0x71   :  { %434 = vmatmul.bf16.gmra.mxu2 %v1495_v4 }
  0x72   :  { %791 = vmatmul.bf16.gmra.mxu0 %v1519_v6 }
  0x73   :  { %943 = vmatmul.bf16.gmra.mxu1 %v1531_v7 }
  0x74   :  { %655 = vmatmul.bf16.gmra.mxu3 %v1507_v5 }
  0x9e   :  { %v123_v8 = vpop.f32.mrf.mxu0 }
  0x9f   :  { %v264_v9 = vpop.f32.mrf.mxu1 }
  0xa0   :  { %v292_v32 = vadd.f32 %v264_v9, %v123_v8 }
  0xa4   :  { %v133_v10 = vpop.f32.mrf.mxu2 }
  0xa6   :  { %v125_v13 = vpop.f32.mrf.mxu0 }
  0xa7   :  { %v274_v11 = vpop.f32.mrf.mxu3  ;;  %v266_v14 = vpop.f32.mrf.mxu1 }
  0xa8   :  { %v1839_v12 = vadd.f32 %v274_v11, %v133_v10  ;;  %v293_v33 = vadd.f32 %v266_v14, %v125_v13 }
  0xac   :  { %v135_v15 = vpop.f32.mrf.mxu2 }
  0xae   :  { %v128_v17 = vpop.f32.mrf.mxu0 }
  0xaf   :  { %v276_v16 = vpop.f32.mrf.mxu3  ;;  %v269_v18 = vpop.f32.mrf.mxu1 }
  0xb0   :  { %v294_v50 = vadd.f32 %v269_v18, %v128_v17  ;;  %v297_v3 = vadd.f32 %v276_v16, %v135_v15 }
  0xb4   :  { %v138_v19 = vpop.f32.mrf.mxu2 }
  0xb6   :  { %v130_v22 = vpop.f32.mrf.mxu0 }
  0xb7   :  { %v279_v20 = vpop.f32.mrf.mxu3  ;;  %v271_v23 = vpop.f32.mrf.mxu1 }
  0xb8   :  { %v1841_v21 = vadd.f32 %v279_v20, %v138_v19  ;;  %v295_v51 = vadd.f32 %v271_v23, %v130_v22 }
  0xbc   :  { %v1843_v24 = vpop.f32.mrf.mxu2 }
  0xbf   :  { %v1845_v25 = vpop.f32.mrf.mxu3  ;;  %v777_v26 = vpop.f32.mrf.mxu0 }
  0xc0   :  { %v929_v27 = vpop.f32.mrf.mxu1 }
  0xc4   :  { %v420_v28 = vpop.f32.mrf.mxu2 }
  0xc5   :  { %v1847_v36 = vadd.f32 %v420_v28, %v292_v32 }
  0xc7   :  { %v641_v29 = vpop.f32.mrf.mxu3  ;;  %v779_v30 = vpop.f32.mrf.mxu0 }
  0xc8   :  { %v931_v31 = vpop.f32.mrf.mxu1  ;;  %v805_v34 = vadd.f32 %v777_v26, %v641_v29 }
  0xca   :  { %v1853_v42 = vadd.f32 %v929_v27, %v805_v34 }
  0xcc   :  { %v422_v35 = vpop.f32.mrf.mxu2 }
  0xcd   :  { %v1849_v37 = vadd.f32 %v422_v35, %v293_v33  ;;  %v299_v33 = vadd.f32 %v1845_v25, %v1843_v24 }
  0xcf   :  { %v643_v38 = vpop.f32.mrf.mxu3  ;;  %v1543_v40 = vpack.c.bf16 %v1849_v37, %v1847_v36  ;;  %v782_v41 = vpop.f32.mrf.mxu0  ;;  %v488_v7 = vadd.f32 %v1849_v37, %v1847_v36 }
  0xd0   :  { %v806_v39 = vadd.f32 %v779_v30, %v643_v38  ;;  %v934_v44 = vpop.f32.mrf.mxu1 }
  0xd1   :  { %1544 = vst [vmem:[%s1949_s2] sm:$0xff] %v1543_v40  }
  0xd2   :  { %v1855_v43 = vadd.f32 %v931_v31, %v806_v39 }
  0xd4   :  { %v1563_v45 = vpack.c.bf16 %v1855_v43, %v1853_v42  ;;  %v425_v46 = vpop.f32.mrf.mxu2  ;;  %v998_v28 = vadd.f32 %v1855_v43, %v1853_v42 }
  0xd5   :  { %v1865_v54 = vadd.f32 %v425_v46, %v294_v50 }
  0xd6   :  { %1583 = vst [vmem:[%s1949_s2 + $0x20] sm:$0xff] %v1563_v45  }
  0xd7   :  { %v646_v47 = vpop.f32.mrf.mxu3  ;;  %v784_v48 = vpop.f32.mrf.mxu0  ;;  %v489_v13 = vadd.f32 %v488_v7, %v1865_v54 }
  0xd8   :  { %v936_v49 = vpop.f32.mrf.mxu1  ;;  %v807_v52 = vadd.f32 %v782_v41, %v646_v47 }
  0xda   :  { %v1871_v60 = vadd.f32 %v934_v44, %v807_v52 }
  0xdc   :  { %v427_v53 = vpop.f32.mrf.mxu2  ;;  %v999_v30 = vadd.f32 %v998_v28, %v1871_v60 }
  0xdd   :  { %v1867_v55 = vadd.f32 %v427_v53, %v295_v51 }
  0xdf   :  { %v648_v56 = vpop.f32.mrf.mxu3  ;;  %v1548_v58 = vpack.c.bf16 %v1867_v55, %v1865_v54  ;;  %v787_v59 = vpop.f32.mrf.mxu0  ;;  %v490_v15 = vadd.f32 %v489_v13, %v1867_v55 }
  0xe0   :  { %v808_v57 = vadd.f32 %v784_v48, %v648_v56  ;;  %v939_v62 = vpop.f32.mrf.mxu1 }
  0xe1   :  { %1580 = vst [vmem:[%s1949_s2 + $0x8] sm:$0xff] %v1548_v58  }
  0xe2   :  { %v1873_v61 = vadd.f32 %v936_v49, %v808_v57 }
  0xe4   :  { %v1568_v63 = vpack.c.bf16 %v1873_v61, %v1871_v60  ;;  %v430_v0 = vpop.f32.mrf.mxu2  ;;  %v1000_v32 = vadd.f32 %v999_v30, %v1873_v61 }
  0xe5   :  { %v452_v8 = vadd.f32 %v430_v0, %v1839_v12 }
  0xe6   :  { %1584 = vst [vmem:[%s1949_s2 + $0x28] sm:$0xff] %v1568_v63  }
  0xe7   :  { %v651_v1 = vpop.f32.mrf.mxu3  ;;  %v789_v2 = vpop.f32.mrf.mxu0  ;;  %v491_v16 = vadd.f32 %v490_v15, %v452_v8 }
  0xe8   :  { %v941_v4 = vpop.f32.mrf.mxu1  ;;  %v809_v5 = vadd.f32 %v787_v59, %v651_v1 }
  0xea   :  { %v1890_v17 = vadd.f32 %v939_v62, %v809_v5 }
  0xec   :  { %v432_v6 = vpop.f32.mrf.mxu2  ;;  %v1001_v34 = vadd.f32 %v1000_v32, %v1890_v17 }
  0xed   :  { %v1886_v9 = vadd.f32 %v432_v6, %v297_v3 }
  0xef   :  { %v653_v10 = vpop.f32.mrf.mxu3  ;;  %v1553_v14 = vpack.c.bf16 %v1886_v9, %v452_v8  ;;  %v792_v19 = vpop.f32.mrf.mxu0  ;;  %v492_v22 = vadd.f32 %v491_v16, %v1886_v9 }
  0xf0   :  { %v810_v11 = vadd.f32 %v789_v2, %v653_v10  ;;  %v944_v23 = vpop.f32.mrf.mxu1 }
  0xf1   :  { %1581 = vst [vmem:[%s1949_s2 + $0x10] sm:$0xff] %v1553_v14  }
  0xf2   :  { %v1892_v18 = vadd.f32 %v941_v4, %v810_v11 }
  0xf4   :  { %v1573_v12 = vpack.c.bf16 %v1892_v18, %v1890_v17  ;;  %v435_v20 = vpop.f32.mrf.mxu2  ;;  %v1002_v41 = vadd.f32 %v1001_v34, %v1892_v18 }
  0xf5   :  { %v454_v26 = vadd.f32 %v435_v20, %v1841_v21 }
  0xf6   :  { %1585 = vst [vmem:[%s1949_s2 + $0x30] sm:$0xff] %v1573_v12  }
  0xf7   :  { %v656_v27 = vpop.f32.mrf.mxu3  ;;  %v493_v29 = vadd.f32 %v492_v22, %v454_v26  ;;  %v794_v39 = vpop.f32.mrf.mxu0 }
  0xf8   :  { %v811_v31 = vadd.f32 %v792_v19, %v656_v27  ;;  %v946_v45 = vpop.f32.mrf.mxu1 }
  0xfa   :  { %v1912_v35 = vadd.f32 %v944_v23, %v811_v31 }
  0xfc   :  { %v437_v38 = vpop.f32.mrf.mxu2  ;;  %v1003_v48 = vadd.f32 %v1002_v41, %v1912_v35 }
  0xfd   :  { %v455_v21 = vadd.f32 %v437_v38, %v299_v33 }
  0xff   :  { %v658_v40 = vpop.f32.mrf.mxu3  ;;  %v1558_v46 = vpack.c.bf16 %v455_v21, %v454_v26  ;;  %v494_v47 = vadd.f32 %v493_v29, %v455_v21 }
 0x100   :  { %v812_v44 = vadd.f32 %v794_v39, %v658_v40 }
 0x101   :  { %1582 = vst [vmem:[%s1949_s2 + $0x18] sm:$0xff] %v1558_v46   ;;  %v495_v24 = vrot.slane %v494_v47, 4 }
 0x102   :  { %v964_v49 = vadd.f32 %v946_v45, %v812_v44 }
 0x103   :  { %v496_v51 = vadd.f32 %v495_v24, %v494_v47 }
 0x104   :  { %v1578_v25 = vpack.c.bf16 %v964_v49, %v1912_v35  ;;  %v1004_v50 = vadd.f32 %v1003_v48, %v964_v49 }
 0x105   :  { %v497_v53 = vrot.slane %v496_v51, 2 }
 0x106   :  { %1586 = vst [vmem:[%s1949_s2 + $0x38] sm:$0xff] %v1578_v25   ;;  %v1005_v52 = vrot.slane %v1004_v50, 4 }
 0x107   :  { %v498_v57 = vadd.f32 %v497_v53, %v496_v51 }
 0x108   :  { %v1006_v56 = vadd.f32 %v1005_v52, %v1004_v50 }
 0x109   :  { %v499_v59 = vrot.slane %v498_v57, 1 }
 0x10a   :  { %v1007_v58 = vrot.slane %v1006_v56, 2 }
 0x10b   :  { %v500_v63 = vadd.f32 %v499_v59, %v498_v57 }
 0x10c   :  { %v1008_v62 = vadd.f32 %v1007_v58, %v1006_v56 }
 0x10d   :  { %v501_v1 = vmul.f32 0.015625, %v500_v63  ;;  %510 = vst [vmem:[%s1950_s3] sm:$0x1] %v500_v63 }
 0x10e   :  { %v1009_v0 = vrot.slane %v1008_v62, 1 }
 0x10f   :  { %v502_v3 = vsub.f32 %v1847_v36, %v501_v1  ;;  %v503_v4 = vsub.f32 %v1849_v37, %v501_v1  ;;  %v504_v5 = vsub.f32 %v1865_v54, %v501_v1  ;;  %v505_v6 = vsub.f32 %v1867_v55, %v501_v1 }
 0x110   :  { %v1010_v2 = vadd.f32 %v1009_v0, %v1008_v62  ;;  %v506_v7 = vsub.f32 %v452_v8, %v501_v1  ;;  %v508_v10 = vsub.f32 %v454_v26, %v501_v1  ;;  %v507_v16 = vsub.f32 %v1886_v9, %v501_v1 }
 0x111   :  { %v511_v11 = vmul.f32 %v502_v3, %v502_v3  ;;  %v512_v13 = vmul.f32 %v503_v4, %v503_v4  ;;  %v513_v14 = vmul.f32 %v504_v5, %v504_v5  ;;  %v514_v36 = vmul.f32 %v505_v6, %v505_v6 }
 0x112   :  { %1020 = vst [vmem:[%s1950_s3 + $0x2] sm:$0x1] %v1010_v2  ;;  %v1011_v12 = vmul.f32 0.015625, %v1010_v2  ;;  %v515_v8 = vmul.f32 %v506_v7, %v506_v7  ;;  %v509_v27 = vsub.f32 %v455_v21, %v501_v1  ;;  %v516_v28 = vmul.f32 %v507_v16, %v507_v16 }
 0x113   :  { %v519_v15 = vadd.f32 %v512_v13, %v511_v11  ;;  %v517_v32 = vmul.f32 %v508_v10, %v508_v10 }
 0x114   :  { %v1012_v37 = vsub.f32 %v1853_v42, %v1011_v12  ;;  %v1013_v54 = vsub.f32 %v1855_v43, %v1011_v12  ;;  %v1014_v55 = vsub.f32 %v1871_v60, %v1011_v12  ;;  %v1015_v22 = vsub.f32 %v1873_v61, %v1011_v12 }
 0x115   :  { %v520_v19 = vadd.f32 %v519_v15, %v513_v14  ;;  %v1016_v30 = vsub.f32 %v1890_v17, %v1011_v12  ;;  %v1017_v42 = vsub.f32 %v1892_v18, %v1011_v12  ;;  %v518_v60 = vmul.f32 %v509_v27, %v509_v27 }
 0x116   :  { %v1021_v23 = vmul.f32 %v1012_v37, %v1012_v37  ;;  %v1022_v26 = vmul.f32 %v1013_v54, %v1013_v54  ;;  %v1023_v9 = vmul.f32 %v1014_v55, %v1014_v55  ;;  %v1024_v43 = vmul.f32 %v1015_v22, %v1015_v22 }
 0x117   :  { %v521_v20 = vadd.f32 %v520_v19, %v514_v36  ;;  %v1018_v39 = vsub.f32 %v1912_v35, %v1011_v12  ;;  %v1025_v61 = vmul.f32 %v1016_v30, %v1016_v30  ;;  %v1019_v21 = vsub.f32 %v964_v49, %v1011_v12 }
 0x118   :  { %v1029_v31 = vadd.f32 %v1022_v26, %v1021_v23  ;;  %v1026_v44 = vmul.f32 %v1017_v42, %v1017_v42 }
 0x119   :  { %v522_v29 = vadd.f32 %v521_v20, %v515_v8  ;;  %v1027_v17 = vmul.f32 %v1018_v39, %v1018_v39  ;;  %v1028_v24 = vmul.f32 %v1019_v21, %v1019_v21 }
 0x11a   :  { %v1030_v34 = vadd.f32 %v1029_v31, %v1023_v9 }
 0x11b   :  { %v523_v33 = vadd.f32 %v522_v29, %v516_v28 }
 0x11c   :  { %v1031_v40 = vadd.f32 %v1030_v34, %v1024_v43 }
 0x11d   :  { %v524_v38 = vadd.f32 %v523_v33, %v517_v32 }
 0x11e   :  { %v1032_v45 = vadd.f32 %v1031_v40, %v1025_v61 }
 0x11f   :  { %v525_v41 = vadd.f32 %v524_v38, %v518_v60 }
 0x120   :  { %v1033_v47 = vadd.f32 %v1032_v45, %v1026_v44 }
 0x121   :  { %v526_v46 = vrot.slane %v525_v41, 4 }
 0x122   :  { %v1034_v25 = vadd.f32 %v1033_v47, %v1027_v17 }
 0x123   :  { %v527_v48 = vadd.f32 %v526_v46, %v525_v41 }
 0x124   :  { %v1035_v18 = vadd.f32 %v1034_v25, %v1028_v24 }
 0x125   :  { %v528_v50 = vrot.slane %v527_v48, 2 }
 0x126   :  { %v1036_v52 = vrot.slane %v1035_v18, 4 }
 0x127   :  { %v529_v51 = vadd.f32 %v528_v50, %v527_v48 }
 0x128   :  { %v1037_v56 = vadd.f32 %v1036_v52, %v1035_v18 }
 0x129   :  { %v530_v53 = vrot.slane %v529_v51, 1 }
 0x12a   :  { %v1038_v35 = vrot.slane %v1037_v56, 2 }
 0x12b   :  { %v531_v57 = vadd.f32 %v530_v53, %v529_v51 }
 0x12c   :  { %v1039_v49 = vadd.f32 %v1038_v35, %v1037_v56 }
 0x12d   :  { %532 = vst [vmem:[%s1950_s3 + $0x1] sm:$0x1] %v531_v57 }
 0x12e   :  { %v1040_v58 = vrot.slane %v1039_v49, 1 }
 0x130   :  { %v1041_v59 = vadd.f32 %v1040_v58, %v1039_v49 }
 0x132   :  { %1042 = vst [vmem:[%s1950_s3 + $0x3] sm:$0x1] %v1041_v59 }

</bundles_post_ra>
